<compile_context>
chip_gen: v5e
topology: v5e:2x2
jax: 0.10.0
libtpu: 0.0.40
codegen_flags: <defaults>
</compile_context>

<pallas_src>
import functools

import numpy as np
import jax
import jax.numpy as jnp
from jax import lax
from jax.experimental import pallas as pl
from jax.experimental.pallas import tpu as pltpu


# --------------------------------------------------------------------------
# Kernel: one image per grid step.  x block layout: (C, Sp) with
# Sp = (H+4)*(W+4) (2 rows/cols of zero padding on every side), spatial on lanes.
# --------------------------------------------------------------------------
def _pce_kernel(x_ref, spat_ref, vab_ref, a1t_ref, a2t_ref, wuc_ref, sc_ref,
                o_ref, *, W, C16):
    f32 = jnp.float32
    x = x_ref[0]                                   # (C, Sp)
    C, Sp = x.shape
    Wp = W + 4                                     # padded row stride
    M = 2 * Wp + 2                                 # max flattened stencil reach

    w3gap = spat_ref[0:1, :]                       # (1, Sp) GAP weights (3x3 fold)
    w5gap = spat_ref[1:2, :]                       # (1, Sp) GAP weights (5x5 fold)
    valid = spat_ref[2:3, :]                       # (1, Sp) 1 inside the image

    # ---- channel contrast attention: GAP folded through the 1x1 conv ---------
    g1 = jnp.sum(x * w3gap, axis=1, keepdims=True)        # (C, 1)  = GAP(x - pool3)
    g2 = jnp.sum(x * w5gap, axis=1, keepdims=True)        # (C, 1)  = GAP(x - pool5)
    u = jnp.zeros((C, 1), f32)
    for j in range(C16):                                   # C//16 is tiny (static loop)
        dj = jnp.sum(a1t_ref[:, j:j + 1] * g1 + a2t_ref[:, j:j + 1] * g2,
                     axis=0, keepdims=True)                # (1, 1) pre-ReLU bottleneck j
        u = u + jnp.maximum(dj, 0.0) * wuc_ref[:, j:j + 1] # conv_up column j
    ca = jax.nn.sigmoid(u)                                 # (C, 1)

    # ---- spatial contrast attention: channel-mean folded into the 1x1 conv ---
    sA = jnp.sum(x * vab_ref[:, 0:1], axis=0, keepdims=True)   # (1, Sp)
    sB = jnp.sum(x * vab_ref[:, 1:2], axis=0, keepdims=True)   # (1, Sp)

    zpad = jnp.zeros((1, M), f32)

    def widen(v):                                   # zero-extend so shifts are slices
        return jnp.concatenate([zpad, v, zpad], axis=1)

    def sh(wide, off):                              # wide[:, M+off : M+off+Sp]
        return wide[:, M + off:M + off + Sp]

    # pyramid avg-pools (count_include_pad) on the single-channel maps, separable
    sAw = widen(sA)
    sBw = widen(sB)
    rw3 = sA + sh(sAw, -1) + sh(sAw, 1)
    rw5 = sB + sh(sBw, -2) + sh(sBw, -1) + sh(sBw, 1) + sh(sBw, 2)
    rw3w = widen(rw3)
    rw5w = widen(rw5)
    pool3 = (rw3 + sh(rw3w, -Wp) + sh(rw3w, Wp)) * (1.0 / 9.0)
    pool5 = (rw5 + sh(rw5w, -2 * Wp) + sh(rw5w, -Wp) +
             sh(rw5w, Wp) + sh(rw5w, 2 * Wp)) * (1.0 / 25.0)

    # mean_c(conv1x1(concat(pf1, pf2))) ; zero outside the image for the 3x3 convs
    m = (sA + sB - pool3 - pool5) * valid

    def conv3x3(v, base):                           # single-channel 3x3 cross-corr.
        vw = widen(v)
        acc = sc_ref[base + 4] * v                  # center tap
        for dh in (-1, 0, 1):
            for dw in (-1, 0, 1):
                if dh == 0 and dw == 0:
                    continue
                tap = sc_ref[base + (dh + 1) * 3 + (dw + 1)]
                acc = acc + tap * sh(vw, dh * Wp + dw)
        return acc

    h1 = jnp.maximum(conv3x3(m, 2), 0.0) * valid    # fc1 + relu (zeroed outside image)
    sa = jax.nn.sigmoid(conv3x3(h1, 11))            # fc2 + sigmoid   (1, Sp)

    # ---- combine: out = x * (1 + alpha*ca + beta*sa) --------------------------
    alpha = sc_ref[0]
    beta = sc_ref[1]
    o_ref[0] = x * (1.0 + alpha * ca + beta * sa)


# --------------------------------------------------------------------------
# Wrapper
# --------------------------------------------------------------------------
def pyramid_contrast_extraction_pallas(x_nchw, Wc1, Wd, Wu, Ws1, wf1, wf2,
                                       alpha, beta):
    N, C, H, W = x_nchw.shape
    C16 = Wd.shape[0]                              # = C // 16
    Hp, Wp = H + 4, W + 4
    Sp = Hp * Wp
    hp = lax.Precision.HIGHEST

    # NCHW with 2 rows/cols of zero padding, spatial flattened onto lanes.
    xpad = jnp.pad(x_nchw.astype(jnp.float32), ((0, 0), (0, 0), (2, 2), (2, 2)))
    x3 = xpad.reshape(N, C, Sp)

    # GAP of (x - pool_k(x)) is a fixed per-pixel weighting (count_include_pad).
    def edge_counts(L, r):
        i = np.arange(L)
        return np.minimum(i, r) + 1 + np.minimum(L - 1 - i, r)

    cnt3 = np.outer(edge_counts(H, 1), edge_counts(W, 1)).astype(np.float64)
    cnt5 = np.outer(edge_counts(H, 2), edge_counts(W, 2)).astype(np.float64)
    w3 = (1.0 - cnt3 / 9.0) / float(H * W)
    w5 = (1.0 - cnt5 / 25.0) / float(H * W)
    spat = np.zeros((8, Hp, Wp), np.float32)
    spat[0, 2:2 + H, 2:2 + W] = w3
    spat[1, 2:2 + H, 2:2 + W] = w5
    spat[2, 2:2 + H, 2:2 + W] = 1.0                 # valid-pixel mask
    spat = jnp.asarray(spat.reshape(8, Sp))

    # Channel attention: fold Wd @ Wc1 (no nonlinearity in between).
    Acat = jnp.matmul(Wd.astype(jnp.float32), Wc1.astype(jnp.float32),
                      precision=hp)                 # (C16, 2C)
    a1t = jnp.transpose(Acat[:, :C])                # (C, C16)
    a2t = jnp.transpose(Acat[:, C:])                # (C, C16)
    wuc = Wu.astype(jnp.float32)                    # (C, C16)

    # Spatial attention: fold the channel mean of the 1x1 conv into two vectors.
    vmean = jnp.mean(Ws1.astype(jnp.float32), axis=0)          # (2C,)
    vab = jnp.stack([vmean[:C], vmean[C:]], axis=1)            # (C, 2)

    # Scalars in SMEM: [alpha, beta, wf1(9, row-major), wf2(9, row-major)]
    sc = jnp.concatenate([
        jnp.asarray([alpha, beta], jnp.float32),
        jnp.asarray(wf1, jnp.float32).reshape(-1),
        jnp.asarray(wf2, jnp.float32).reshape(-1),
    ])

    kernel = functools.partial(_pce_kernel, W=W, C16=C16)
    out3 = pl.pallas_call(
        kernel,
        out_shape=jax.ShapeDtypeStruct((N, C, Sp), jnp.float32),
        grid=(N,),
        in_specs=[
            pl.BlockSpec((1, C, Sp), lambda n: (n, 0, 0)),        # x (one image)
            pl.BlockSpec((8, Sp), lambda n: (0, 0)),              # GAP weights + mask
            pl.BlockSpec((C, 2), lambda n: (0, 0)),               # folded spatial 1x1
            pl.BlockSpec((C, C16), lambda n: (0, 0)),             # (Wd@Wc1)[:, :C]^T
            pl.BlockSpec((C, C16), lambda n: (0, 0)),             # (Wd@Wc1)[:, C:]^T
            pl.BlockSpec((C, C16), lambda n: (0, 0)),             # Wu
            pl.BlockSpec(memory_space=pltpu.MemorySpace.SMEM),    # alpha/beta/wf1/wf2
        ],
        out_specs=pl.BlockSpec((1, C, Sp), lambda n: (n, 0, 0)),
        compiler_params=pltpu.CompilerParams(
            dimension_semantics=("parallel",),
            vmem_limit_bytes=32 * 1024 * 1024),
    )(x3, spat, vab, a1t, a2t, wuc, sc)

    # strip the spatial padding; layout is already NCHW
    return out3.reshape(N, C, Hp, Wp)[:, :, 2:2 + H, 2:2 + W]


# --------------------------------------------------------------------------
# Pure-JAX reference (mirrors the PyTorch module semantics, highest precision)
# --------------------------------------------------------------------------
def _reference(x, Wc1, Wd, Wu, Ws1, wf1, wf2, alpha, beta):
    hp = lax.Precision.HIGHEST

    def avg_pool(v, k):
        p = (k - 1) // 2
        s = lax.reduce_window(v, 0.0, lax.add, (1, 1, k, k), (1, 1, 1, 1),
                              [(0, 0), (0, 0), (p, p), (p, p)])
        return s / float(k * k)

    def conv3(v, w):
        return lax.conv_general_dilated(
            v, w.reshape(1, 1, 3, 3), (1, 1), [(1, 1), (1, 1)],
            dimension_numbers=('NCHW', 'OIHW', 'NCHW'), precision=hp)

    pf1 = x - avg_pool(x, 3)
    pf2 = x - avg_pool(x, 5)
    mp = jnp.concatenate([pf1, pf2], axis=1)

    y = jnp.einsum('nihw,oi->nohw', mp, Wc1, precision=hp)
    g = jnp.mean(y, axis=(2, 3), keepdims=True)
    d = jax.nn.relu(jnp.einsum('nihw,oi->nohw', g, Wd, precision=hp))
    u = jnp.einsum('nihw,oi->nohw', d, Wu, precision=hp)
    ca = jax.nn.sigmoid(u)

    z = jnp.einsum('nihw,oi->nohw', mp, Ws1, precision=hp)
    m = jnp.mean(z, axis=1, keepdims=True)
    h = jax.nn.relu(conv3(m, wf1))
    sa = jax.nn.sigmoid(conv3(h, wf2))

    return x + alpha * ca * x + beta * sa * x


# --------------------------------------------------------------------------
if __name__ == "__main__":
    # in_channels must be >= 16 (the module uses out_channels // 16), so use C=32.
    N, C, H, W = 2, 32, 16, 16

    key = jax.random.PRNGKey(0)
    ks = jax.random.split(key, 7)
    x = jax.random.normal(ks[0], (N, C, H, W), jnp.float32)

    # Deterministic synthetic parameters (shapes from the module __init__)
    Wc1 = 0.1 * jax.random.normal(ks[1], (C, 2 * C), jnp.float32)     # conv1x1 (channel att)
    Wd = 0.1 * jax.random.normal(ks[2], (C // 16, C), jnp.float32)    # conv_down
    Wu = 0.1 * jax.random.normal(ks[3], (C, C // 16), jnp.float32)    # conv_up
    Ws1 = 0.1 * jax.random.normal(ks[4], (C, 2 * C), jnp.float32)     # conv1x1 (spatial att)
    wf1 = 0.3 * jax.random.normal(ks[5], (3, 3), jnp.float32)         # fc1 3x3
    wf2 = 0.3 * jax.random.normal(ks[6], (3, 3), jnp.float32)         # fc2 3x3
    alpha = 1.0                                                        # nn.Parameter(ones(1))
    beta = 1.0                                                         # nn.Parameter(ones(1))

    out = pyramid_contrast_extraction_pallas(x, Wc1, Wd, Wu, Ws1, wf1, wf2, alpha, beta)
    out = jax.block_until_ready(out)

    ref = jax.block_until_ready(_reference(x, Wc1, Wd, Wu, Ws1, wf1, wf2, alpha, beta))
    max_diff = float(jnp.max(jnp.abs(out - ref)))
    assert out.shape == (N, C, H, W), out.shape
    assert max_diff < 1e-3, f"kernel/reference mismatch: max |diff| = {max_diff}"
    print("KERNEL_OK")
</pallas_src>

<mosaic_0001>
module attributes {stable_mosaic.version = 11 : i64} {
  func.func @_pce_kernel(%arg0: i32, %arg1: memref<1x32x400xf32, #tpu.memory_space<vmem>>, %arg2: memref<8x400xf32, #tpu.memory_space<vmem>>, %arg3: memref<32x2xf32, #tpu.memory_space<vmem>>, %arg4: memref<32x2xf32, #tpu.memory_space<vmem>>, %arg5: memref<32x2xf32, #tpu.memory_space<vmem>>, %arg6: memref<32x2xf32, #tpu.memory_space<vmem>>, %arg7: memref<20xf32, #tpu.memory_space<smem>>, %arg8: memref<1x32x400xf32, #tpu.memory_space<vmem>>) attributes {dimension_semantics = [#tpu.dimension_semantics<parallel>], iteration_bounds = array<i64: 2>, scalar_prefetch = 0 : i64, scratch_operands = 0 : i64, tpu.core_type = #tpu.core_type<tc>, window_params = [{transform_indices = @transform_0, window_bounds = array<i64: 1, 32, 400>}, {pipeline_mode = #tpu.pipeline_mode<synchronous>, transform_indices = @transform_1, window_bounds = array<i64: 8, 400>}, {pipeline_mode = #tpu.pipeline_mode<synchronous>, transform_indices = @transform_2, window_bounds = array<i64: 32, 2>}, {pipeline_mode = #tpu.pipeline_mode<synchronous>, transform_indices = @transform_3, window_bounds = array<i64: 32, 2>}, {pipeline_mode = #tpu.pipeline_mode<synchronous>, transform_indices = @transform_4, window_bounds = array<i64: 32, 2>}, {pipeline_mode = #tpu.pipeline_mode<synchronous>, transform_indices = @transform_5, window_bounds = array<i64: 32, 2>}, {transform_indices = @transform_6, window_bounds = array<i64: 20>}, {transform_indices = @transform_7, window_bounds = array<i64: 1, 32, 400>}]} {
    %c0 = arith.constant 0 : index
    %c0_0 = arith.constant 0 : index
    %c0_1 = arith.constant 0 : index
    %0 = vector.load %arg1[%c0, %c0_0, %c0_1] : memref<1x32x400xf32, #tpu.memory_space<vmem>>, vector<1x32x400xf32>
    %1 = vector.shape_cast %0 : vector<1x32x400xf32> to vector<32x400xf32>
    %c0_2 = arith.constant 0 : index
    %c0_3 = arith.constant 0 : index
    %2 = vector.load %arg2[%c0_2, %c0_3] : memref<8x400xf32, #tpu.memory_space<vmem>>, vector<1x400xf32>
    %c1 = arith.constant 1 : index
    %c0_4 = arith.constant 0 : index
    %3 = vector.load %arg2[%c1, %c0_4] : memref<8x400xf32, #tpu.memory_space<vmem>>, vector<1x400xf32>
    %c2 = arith.constant 2 : index
    %c0_5 = arith.constant 0 : index
    %4 = vector.load %arg2[%c2, %c0_5] : memref<8x400xf32, #tpu.memory_space<vmem>>, vector<1x400xf32>
    %5 = vector.broadcast %2 : vector<1x400xf32> to vector<32x400xf32>
    %6 = arith.mulf %1, %5 : vector<32x400xf32>
    %cst = arith.constant dense<0.000000e+00> : vector<32xf32>
    %7 = vector.multi_reduction <add>, %6, %cst [1] : vector<32x400xf32> to vector<32xf32>
    %8 = vector.shape_cast %7 : vector<32xf32> to vector<32x1xf32>
    %9 = vector.broadcast %3 : vector<1x400xf32> to vector<32x400xf32>
    %10 = arith.mulf %1, %9 : vector<32x400xf32>
    %cst_6 = arith.constant dense<0.000000e+00> : vector<32xf32>
    %11 = vector.multi_reduction <add>, %10, %cst_6 [1] : vector<32x400xf32> to vector<32xf32>
    %12 = vector.shape_cast %11 : vector<32xf32> to vector<32x1xf32>
    %cst_7 = arith.constant 0.000000e+00 : f32
    %13 = vector.broadcast %cst_7 : f32 to vector<32x1xf32>
    %c0_8 = arith.constant 0 : index
    %c0_9 = arith.constant 0 : index
    %14 = vector.load %arg4[%c0_8, %c0_9] : memref<32x2xf32, #tpu.memory_space<vmem>>, vector<32x1xf32>
    %15 = arith.mulf %14, %8 : vector<32x1xf32>
    %c0_10 = arith.constant 0 : index
    %c0_11 = arith.constant 0 : index
    %16 = vector.load %arg5[%c0_10, %c0_11] : memref<32x2xf32, #tpu.memory_space<vmem>>, vector<32x1xf32>
    %17 = arith.mulf %16, %12 : vector<32x1xf32>
    %18 = arith.addf %15, %17 : vector<32x1xf32>
    %cst_12 = arith.constant dense<0.000000e+00> : vector<1xf32>
    %19 = vector.multi_reduction <add>, %18, %cst_12 [0] : vector<32x1xf32> to vector<1xf32>
    %20 = vector.shape_cast %19 : vector<1xf32> to vector<1x1xf32>
    %cst_13 = arith.constant 0.000000e+00 : f32
    %21 = vector.broadcast %cst_13 : f32 to vector<1x1xf32>
    %22 = arith.maximumf %20, %21 : vector<1x1xf32>
    %c0_14 = arith.constant 0 : index
    %c0_15 = arith.constant 0 : index
    %23 = vector.load %arg6[%c0_14, %c0_15] : memref<32x2xf32, #tpu.memory_space<vmem>>, vector<32x1xf32>
    %24 = vector.broadcast %22 : vector<1x1xf32> to vector<32x1xf32>
    %25 = arith.mulf %24, %23 : vector<32x1xf32>
    %26 = arith.addf %13, %25 : vector<32x1xf32>
    %c0_16 = arith.constant 0 : index
    %c1_17 = arith.constant 1 : index
    %27 = vector.load %arg4[%c0_16, %c1_17] : memref<32x2xf32, #tpu.memory_space<vmem>>, vector<32x1xf32>
    %28 = arith.mulf %27, %8 : vector<32x1xf32>
    %c0_18 = arith.constant 0 : index
    %c1_19 = arith.constant 1 : index
    %29 = vector.load %arg5[%c0_18, %c1_19] : memref<32x2xf32, #tpu.memory_space<vmem>>, vector<32x1xf32>
    %30 = arith.mulf %29, %12 : vector<32x1xf32>
    %31 = arith.addf %28, %30 : vector<32x1xf32>
    %cst_20 = arith.constant dense<0.000000e+00> : vector<1xf32>
    %32 = vector.multi_reduction <add>, %31, %cst_20 [0] : vector<32x1xf32> to vector<1xf32>
    %33 = vector.shape_cast %32 : vector<1xf32> to vector<1x1xf32>
    %cst_21 = arith.constant 0.000000e+00 : f32
    %34 = vector.broadcast %cst_21 : f32 to vector<1x1xf32>
    %35 = arith.maximumf %33, %34 : vector<1x1xf32>
    %c0_22 = arith.constant 0 : index
    %c1_23 = arith.constant 1 : index
    %36 = vector.load %arg6[%c0_22, %c1_23] : memref<32x2xf32, #tpu.memory_space<vmem>>, vector<32x1xf32>
    %37 = vector.broadcast %35 : vector<1x1xf32> to vector<32x1xf32>
    %38 = arith.mulf %37, %36 : vector<32x1xf32>
    %39 = arith.addf %26, %38 : vector<32x1xf32>
    %40 = arith.negf %39 : vector<32x1xf32>
    %41 = math.exp %40 : vector<32x1xf32>
    %cst_24 = arith.constant 1.000000e+00 : f32
    %42 = vector.broadcast %cst_24 : f32 to vector<32x1xf32>
    %43 = arith.addf %42, %41 : vector<32x1xf32>
    %44 = arith.divf %42, %43 : vector<32x1xf32>
    %c0_25 = arith.constant 0 : index
    %c0_26 = arith.constant 0 : index
    %45 = vector.load %arg3[%c0_25, %c0_26] : memref<32x2xf32, #tpu.memory_space<vmem>>, vector<32x1xf32>
    %46 = vector.broadcast %45 : vector<32x1xf32> to vector<32x400xf32>
    %47 = arith.mulf %1, %46 : vector<32x400xf32>
    %cst_27 = arith.constant dense<0.000000e+00> : vector<400xf32>
    %48 = vector.multi_reduction <add>, %47, %cst_27 [0] : vector<32x400xf32> to vector<400xf32>
    %49 = vector.shape_cast %48 : vector<400xf32> to vector<1x400xf32>
    %c0_28 = arith.constant 0 : index
    %c1_29 = arith.constant 1 : index
    %50 = vector.load %arg3[%c0_28, %c1_29] : memref<32x2xf32, #tpu.memory_space<vmem>>, vector<32x1xf32>
    %51 = vector.broadcast %50 : vector<32x1xf32> to vector<32x400xf32>
    %52 = arith.mulf %1, %51 : vector<32x400xf32>
    %cst_30 = arith.constant dense<0.000000e+00> : vector<400xf32>
    %53 = vector.multi_reduction <add>, %52, %cst_30 [0] : vector<32x400xf32> to vector<400xf32>
    %54 = vector.shape_cast %53 : vector<400xf32> to vector<1x400xf32>
    %cst_31 = arith.constant 0.000000e+00 : f32
    %55 = vector.broadcast %cst_31 : f32 to vector<1x42xf32>
    %56 = tpu.concatenate %55, %49, %55 in 1 : vector<1x42xf32>, vector<1x400xf32>, vector<1x42xf32> -> vector<1x484xf32>
    %57 = tpu.concatenate %55, %54, %55 in 1 : vector<1x42xf32>, vector<1x400xf32>, vector<1x42xf32> -> vector<1x484xf32>
    %58 = vector.extract_strided_slice %56 {offsets = [0, 41], sizes = [1, 400], strides = [1, 1]} : vector<1x484xf32> to vector<1x400xf32>
    %59 = arith.addf %49, %58 : vector<1x400xf32>
    %60 = vector.extract_strided_slice %56 {offsets = [0, 43], sizes = [1, 400], strides = [1, 1]} : vector<1x484xf32> to vector<1x400xf32>
    %61 = arith.addf %59, %60 : vector<1x400xf32>
    %62 = vector.extract_strided_slice %57 {offsets = [0, 40], sizes = [1, 400], strides = [1, 1]} : vector<1x484xf32> to vector<1x400xf32>
    %63 = arith.addf %54, %62 : vector<1x400xf32>
    %64 = vector.extract_strided_slice %57 {offsets = [0, 41], sizes = [1, 400], strides = [1, 1]} : vector<1x484xf32> to vector<1x400xf32>
    %65 = arith.addf %63, %64 : vector<1x400xf32>
    %66 = vector.extract_strided_slice %57 {offsets = [0, 43], sizes = [1, 400], strides = [1, 1]} : vector<1x484xf32> to vector<1x400xf32>
    %67 = arith.addf %65, %66 : vector<1x400xf32>
    %68 = vector.extract_strided_slice %57 {offsets = [0, 44], sizes = [1, 400], strides = [1, 1]} : vector<1x484xf32> to vector<1x400xf32>
    %69 = arith.addf %67, %68 : vector<1x400xf32>
    %70 = tpu.concatenate %55, %61, %55 in 1 : vector<1x42xf32>, vector<1x400xf32>, vector<1x42xf32> -> vector<1x484xf32>
    %71 = tpu.concatenate %55, %69, %55 in 1 : vector<1x42xf32>, vector<1x400xf32>, vector<1x42xf32> -> vector<1x484xf32>
    %72 = vector.extract_strided_slice %70 {offsets = [0, 22], sizes = [1, 400], strides = [1, 1]} : vector<1x484xf32> to vector<1x400xf32>
    %73 = arith.addf %61, %72 : vector<1x400xf32>
    %74 = vector.extract_strided_slice %70 {offsets = [0, 62], sizes = [1, 400], strides = [1, 1]} : vector<1x484xf32> to vector<1x400xf32>
    %75 = arith.addf %73, %74 : vector<1x400xf32>
    %cst_32 = arith.constant 0.111111112 : f32
    %76 = vector.broadcast %cst_32 : f32 to vector<1x400xf32>
    %77 = arith.mulf %75, %76 : vector<1x400xf32>
    %78 = vector.extract_strided_slice %71 {offsets = [0, 2], sizes = [1, 400], strides = [1, 1]} : vector<1x484xf32> to vector<1x400xf32>
    %79 = arith.addf %69, %78 : vector<1x400xf32>
    %80 = vector.extract_strided_slice %71 {offsets = [0, 22], sizes = [1, 400], strides = [1, 1]} : vector<1x484xf32> to vector<1x400xf32>
    %81 = arith.addf %79, %80 : vector<1x400xf32>
    %82 = vector.extract_strided_slice %71 {offsets = [0, 62], sizes = [1, 400], strides = [1, 1]} : vector<1x484xf32> to vector<1x400xf32>
    %83 = arith.addf %81, %82 : vector<1x400xf32>
    %84 = vector.extract_strided_slice %71 {offsets = [0, 82], sizes = [1, 400], strides = [1, 1]} : vector<1x484xf32> to vector<1x400xf32>
    %85 = arith.addf %83, %84 : vector<1x400xf32>
    %cst_33 = arith.constant 4.000000e-02 : f32
    %86 = vector.broadcast %cst_33 : f32 to vector<1x400xf32>
    %87 = arith.mulf %85, %86 : vector<1x400xf32>
    %88 = arith.addf %49, %54 : vector<1x400xf32>
    %89 = arith.subf %88, %77 : vector<1x400xf32>
    %90 = arith.subf %89, %87 : vector<1x400xf32>
    %91 = arith.mulf %90, %4 : vector<1x400xf32>
    %92 = tpu.concatenate %55, %91, %55 in 1 : vector<1x42xf32>, vector<1x400xf32>, vector<1x42xf32> -> vector<1x484xf32>
    %c6 = arith.constant 6 : index
    %93 = memref.load %arg7[%c6] : memref<20xf32, #tpu.memory_space<smem>>
    %94 = vector.broadcast %93 : f32 to vector<1x400xf32>
    %95 = arith.mulf %94, %91 : vector<1x400xf32>
    %c2_34 = arith.constant 2 : index
    %96 = memref.load %arg7[%c2_34] : memref<20xf32, #tpu.memory_space<smem>>
    %97 = vector.extract_strided_slice %92 {offsets = [0, 21], sizes = [1, 400], strides = [1, 1]} : vector<1x484xf32> to vector<1x400xf32>
    %98 = vector.broadcast %96 : f32 to vector<1x400xf32>
    %99 = arith.mulf %98, %97 : vector<1x400xf32>
    %100 = arith.addf %95, %99 : vector<1x400xf32>
    %c3 = arith.constant 3 : index
    %101 = memref.load %arg7[%c3] : memref<20xf32, #tpu.memory_space<smem>>
    %102 = vector.extract_strided_slice %92 {offsets = [0, 22], sizes = [1, 400], strides = [1, 1]} : vector<1x484xf32> to vector<1x400xf32>
    %103 = vector.broadcast %101 : f32 to vector<1x400xf32>
    %104 = arith.mulf %103, %102 : vector<1x400xf32>
    %105 = arith.addf %100, %104 : vector<1x400xf32>
    %c4 = arith.constant 4 : index
    %106 = memref.load %arg7[%c4] : memref<20xf32, #tpu.memory_space<smem>>
    %107 = vector.extract_strided_slice %92 {offsets = [0, 23], sizes = [1, 400], strides = [1, 1]} : vector<1x484xf32> to vector<1x400xf32>
    %108 = vector.broadcast %106 : f32 to vector<1x400xf32>
    %109 = arith.mulf %108, %107 : vector<1x400xf32>
    %110 = arith.addf %105, %109 : vector<1x400xf32>
    %c5 = arith.constant 5 : index
    %111 = memref.load %arg7[%c5] : memref<20xf32, #tpu.memory_space<smem>>
    %112 = vector.extract_strided_slice %92 {offsets = [0, 41], sizes = [1, 400], strides = [1, 1]} : vector<1x484xf32> to vector<1x400xf32>
    %113 = vector.broadcast %111 : f32 to vector<1x400xf32>
    %114 = arith.mulf %113, %112 : vector<1x400xf32>
    %115 = arith.addf %110, %114 : vector<1x400xf32>
    %c7 = arith.constant 7 : index
    %116 = memref.load %arg7[%c7] : memref<20xf32, #tpu.memory_space<smem>>
    %117 = vector.extract_strided_slice %92 {offsets = [0, 43], sizes = [1, 400], strides = [1, 1]} : vector<1x484xf32> to vector<1x400xf32>
    %118 = vector.broadcast %116 : f32 to vector<1x400xf32>
    %119 = arith.mulf %118, %117 : vector<1x400xf32>
    %120 = arith.addf %115, %119 : vector<1x400xf32>
    %c8 = arith.constant 8 : index
    %121 = memref.load %arg7[%c8] : memref<20xf32, #tpu.memory_space<smem>>
    %122 = vector.extract_strided_slice %92 {offsets = [0, 61], sizes = [1, 400], strides = [1, 1]} : vector<1x484xf32> to vector<1x400xf32>
    %123 = vector.broadcast %121 : f32 to vector<1x400xf32>
    %124 = arith.mulf %123, %122 : vector<1x400xf32>
    %125 = arith.addf %120, %124 : vector<1x400xf32>
    %c9 = arith.constant 9 : index
    %126 = memref.load %arg7[%c9] : memref<20xf32, #tpu.memory_space<smem>>
    %127 = vector.extract_strided_slice %92 {offsets = [0, 62], sizes = [1, 400], strides = [1, 1]} : vector<1x484xf32> to vector<1x400xf32>
    %128 = vector.broadcast %126 : f32 to vector<1x400xf32>
    %129 = arith.mulf %128, %127 : vector<1x400xf32>
    %130 = arith.addf %125, %129 : vector<1x400xf32>
    %c10 = arith.constant 10 : index
    %131 = memref.load %arg7[%c10] : memref<20xf32, #tpu.memory_space<smem>>
    %132 = vector.extract_strided_slice %92 {offsets = [0, 63], sizes = [1, 400], strides = [1, 1]} : vector<1x484xf32> to vector<1x400xf32>
    %133 = vector.broadcast %131 : f32 to vector<1x400xf32>
    %134 = arith.mulf %133, %132 : vector<1x400xf32>
    %135 = arith.addf %130, %134 : vector<1x400xf32>
    %cst_35 = arith.constant 0.000000e+00 : f32
    %136 = vector.broadcast %cst_35 : f32 to vector<1x400xf32>
    %137 = arith.maximumf %135, %136 : vector<1x400xf32>
    %138 = arith.mulf %137, %4 : vector<1x400xf32>
    %139 = tpu.concatenate %55, %138, %55 in 1 : vector<1x42xf32>, vector<1x400xf32>, vector<1x42xf32> -> vector<1x484xf32>
    %c15 = arith.constant 15 : index
    %140 = memref.load %arg7[%c15] : memref<20xf32, #tpu.memory_space<smem>>
    %141 = vector.broadcast %140 : f32 to vector<1x400xf32>
    %142 = arith.mulf %141, %138 : vector<1x400xf32>
    %c11 = arith.constant 11 : index
    %143 = memref.load %arg7[%c11] : memref<20xf32, #tpu.memory_space<smem>>
    %144 = vector.extract_strided_slice %139 {offsets = [0, 21], sizes = [1, 400], strides = [1, 1]} : vector<1x484xf32> to vector<1x400xf32>
    %145 = vector.broadcast %143 : f32 to vector<1x400xf32>
    %146 = arith.mulf %145, %144 : vector<1x400xf32>
    %147 = arith.addf %142, %146 : vector<1x400xf32>
    %c12 = arith.constant 12 : index
    %148 = memref.load %arg7[%c12] : memref<20xf32, #tpu.memory_space<smem>>
    %149 = vector.extract_strided_slice %139 {offsets = [0, 22], sizes = [1, 400], strides = [1, 1]} : vector<1x484xf32> to vector<1x400xf32>
    %150 = vector.broadcast %148 : f32 to vector<1x400xf32>
    %151 = arith.mulf %150, %149 : vector<1x400xf32>
    %152 = arith.addf %147, %151 : vector<1x400xf32>
    %c13 = arith.constant 13 : index
    %153 = memref.load %arg7[%c13] : memref<20xf32, #tpu.memory_space<smem>>
    %154 = vector.extract_strided_slice %139 {offsets = [0, 23], sizes = [1, 400], strides = [1, 1]} : vector<1x484xf32> to vector<1x400xf32>
    %155 = vector.broadcast %153 : f32 to vector<1x400xf32>
    %156 = arith.mulf %155, %154 : vector<1x400xf32>
    %157 = arith.addf %152, %156 : vector<1x400xf32>
    %c14 = arith.constant 14 : index
    %158 = memref.load %arg7[%c14] : memref<20xf32, #tpu.memory_space<smem>>
    %159 = vector.extract_strided_slice %139 {offsets = [0, 41], sizes = [1, 400], strides = [1, 1]} : vector<1x484xf32> to vector<1x400xf32>
    %160 = vector.broadcast %158 : f32 to vector<1x400xf32>
    %161 = arith.mulf %160, %159 : vector<1x400xf32>
    %162 = arith.addf %157, %161 : vector<1x400xf32>
    %c16 = arith.constant 16 : index
    %163 = memref.load %arg7[%c16] : memref<20xf32, #tpu.memory_space<smem>>
    %164 = vector.extract_strided_slice %139 {offsets = [0, 43], sizes = [1, 400], strides = [1, 1]} : vector<1x484xf32> to vector<1x400xf32>
    %165 = vector.broadcast %163 : f32 to vector<1x400xf32>
    %166 = arith.mulf %165, %164 : vector<1x400xf32>
    %167 = arith.addf %162, %166 : vector<1x400xf32>
    %c17 = arith.constant 17 : index
    %168 = memref.load %arg7[%c17] : memref<20xf32, #tpu.memory_space<smem>>
    %169 = vector.extract_strided_slice %139 {offsets = [0, 61], sizes = [1, 400], strides = [1, 1]} : vector<1x484xf32> to vector<1x400xf32>
    %170 = vector.broadcast %168 : f32 to vector<1x400xf32>
    %171 = arith.mulf %170, %169 : vector<1x400xf32>
    %172 = arith.addf %167, %171 : vector<1x400xf32>
    %c18 = arith.constant 18 : index
    %173 = memref.load %arg7[%c18] : memref<20xf32, #tpu.memory_space<smem>>
    %174 = vector.extract_strided_slice %139 {offsets = [0, 62], sizes = [1, 400], strides = [1, 1]} : vector<1x484xf32> to vector<1x400xf32>
    %175 = vector.broadcast %173 : f32 to vector<1x400xf32>
    %176 = arith.mulf %175, %174 : vector<1x400xf32>
    %177 = arith.addf %172, %176 : vector<1x400xf32>
    %c19 = arith.constant 19 : index
    %178 = memref.load %arg7[%c19] : memref<20xf32, #tpu.memory_space<smem>>
    %179 = vector.extract_strided_slice %139 {offsets = [0, 63], sizes = [1, 400], strides = [1, 1]} : vector<1x484xf32> to vector<1x400xf32>
    %180 = vector.broadcast %178 : f32 to vector<1x400xf32>
    %181 = arith.mulf %180, %179 : vector<1x400xf32>
    %182 = arith.addf %177, %181 : vector<1x400xf32>
    %183 = arith.negf %182 : vector<1x400xf32>
    %184 = math.exp %183 : vector<1x400xf32>
    %cst_36 = arith.constant 1.000000e+00 : f32
    %185 = vector.broadcast %cst_36 : f32 to vector<1x400xf32>
    %186 = arith.addf %185, %184 : vector<1x400xf32>
    %187 = arith.divf %185, %186 : vector<1x400xf32>
    %c0_37 = arith.constant 0 : index
    %188 = memref.load %arg7[%c0_37] : memref<20xf32, #tpu.memory_space<smem>>
    %c1_38 = arith.constant 1 : index
    %189 = memref.load %arg7[%c1_38] : memref<20xf32, #tpu.memory_space<smem>>
    %190 = vector.broadcast %188 : f32 to vector<32x1xf32>
    %191 = arith.mulf %190, %44 : vector<32x1xf32>
    %cst_39 = arith.constant 1.000000e+00 : f32
    %192 = vector.broadcast %cst_39 : f32 to vector<32x1xf32>
    %193 = arith.addf %192, %191 : vector<32x1xf32>
    %194 = vector.broadcast %189 : f32 to vector<1x400xf32>
    %195 = arith.mulf %194, %187 : vector<1x400xf32>
    %196 = vector.broadcast %193 : vector<32x1xf32> to vector<32x400xf32>
    %197 = vector.broadcast %195 : vector<1x400xf32> to vector<32x400xf32>
    %198 = arith.addf %196, %197 : vector<32x400xf32>
    %199 = arith.mulf %1, %198 : vector<32x400xf32>
    %c0_40 = arith.constant 0 : index
    %c0_41 = arith.constant 0 : index
    %c0_42 = arith.constant 0 : index
    %200 = vector.load %arg8[%c0_40, %c0_41, %c0_42] : memref<1x32x400xf32, #tpu.memory_space<vmem>>, vector<1x32x400xf32>
    %201 = vector.shape_cast %200 : vector<1x32x400xf32> to vector<32x400xf32>
    %202 = vector.shape_cast %199 : vector<32x400xf32> to vector<1x32x400xf32>
    tpu.vector_store %arg8[%c0_40, %c0_41, %c0_42], %202 {strides = array<i32>} : memref<1x32x400xf32, #tpu.memory_space<vmem>>, vector<1x32x400xf32>,
    return
  }
  func.func @transform_0(%arg0: i32) -> (i32, i32, i32) {
    %c0_i32 = arith.constant 0 : i32
    %c0_i32_0 = arith.constant 0 : i32
    %c0_i32_1 = arith.constant 0 : i32
    return %arg0, %c0_i32, %c0_i32_0 : i32, i32, i32
  }
  func.func @transform_1(%arg0: i32) -> (i32, i32) {
    %c0_i32 = arith.constant 0 : i32
    %c0_i32_0 = arith.constant 0 : i32
    %c0_i32_1 = arith.constant 0 : i32
    return %c0_i32, %c0_i32_0 : i32, i32
  }
  func.func @transform_2(%arg0: i32) -> (i32, i32) {
    %c0_i32 = arith.constant 0 : i32
    %c0_i32_0 = arith.constant 0 : i32
    %c0_i32_1 = arith.constant 0 : i32
    return %c0_i32, %c0_i32_0 : i32, i32
  }
  func.func @transform_3(%arg0: i32) -> (i32, i32) {
    %c0_i32 = arith.constant 0 : i32
    %c0_i32_0 = arith.constant 0 : i32
    %c0_i32_1 = arith.constant 0 : i32
    return %c0_i32, %c0_i32_0 : i32, i32
  }
  func.func @transform_4(%arg0: i32) -> (i32, i32) {
    %c0_i32 = arith.constant 0 : i32
    %c0_i32_0 = arith.constant 0 : i32
    %c0_i32_1 = arith.constant 0 : i32
    return %c0_i32, %c0_i32_0 : i32, i32
  }
  func.func @transform_5(%arg0: i32) -> (i32, i32) {
    %c0_i32 = arith.constant 0 : i32
    %c0_i32_0 = arith.constant 0 : i32
    %c0_i32_1 = arith.constant 0 : i32
    return %c0_i32, %c0_i32_0 : i32, i32
  }
  func.func @transform_6(%arg0: i32) -> i32 {
    %c0_i32 = arith.constant 0 : i32
    %c0_i32_0 = arith.constant 0 : i32
    return %c0_i32 : i32
  }
  func.func @transform_7(%arg0: i32) -> (i32, i32, i32) {
    %c0_i32 = arith.constant 0 : i32
    %c0_i32_0 = arith.constant 0 : i32
    %c0_i32_1 = arith.constant 0 : i32
    return %arg0, %c0_i32, %c0_i32_0 : i32, i32, i32
  }
}

</mosaic_0001>

<bundles_post_ra>
// kernel: tpu_custom_call.1
= control target key start
LH: loop header
LB: loop body
LE: loop exit
PB: predicated region body
PF: predicated region fallthrough
CT: control target
= control target key end

     0   :  { %s3337_s0 = inlined_call_operand.hbm [shape: f32[2,32,400], index: 0, kind: input, shape index: {}]   ;;  %s3338_s1 = inlined_call_operand.vmem [shape: f32[8,400], index: 1, kind: input, shape index: {}]   ;;  %s3339_s2 = inlined_call_operand.vmem [shape: f32[32,2], index: 2, kind: input, shape index: {}]   ;;  %s3340_s3 = inlined_call_operand.vmem [shape: f32[32,2], index: 3, kind: input, shape index: {}]   ;;  %s3341_s4 = inlined_call_operand.vmem [shape: f32[32,2], index: 4, kind: input, shape index: {}]   ;;  %s3342_s5 = inlined_call_operand.vmem [shape: f32[32,2], index: 5, kind: input, shape index: {}]   ;;  %s3343_s6 = inlined_call_operand.vmem [shape: f32[20], index: 6, kind: input, shape index: {}]   ;;  %s3344_s7 = inlined_call_operand.hbm [shape: f32[2,32,400], index: 7, kind: output, shape index: {}]  }
   0x1   :  { %3350 = sst [smem:[#allocation14_spill]] %s3343_s6 }
   0x2   :  { %12 = vsyncpa [#allocation3], 0 }
   0x3   :  { %14 = vsyncpa [#allocation3 + $0x1], 0 }
   0x4   :  { %15 = vsyncpa [#allocation5], 0 }
   0x5   :  { %16 = vsyncpa [#allocation4], 0 }
   0x6   :  { %18 = vsyncpa [#allocation4 + $0x1], 0  ;;  %s2253_s24 = smov 0   ;;  %s2255_s25 = smov 0  }
   0x7   :  { %s2257_s26 = smov 0   ;;  %s2259_s27 = smov 0  }
   0x8 LB: > { %3351 = sst [smem:[#allocation11_spill]] %s2186_s26  ;;  %s2274_s28 = sadd.s32 4294967295, %s2190_s27   ;;  %s2190_s27 = sphi %s2259_s27, %s3377_s27   ;;  %s2186_s26 = sphi %s2257_s26, %s3379_s26   ;;  %s2182_s25 = sphi %s2255_s25, %s3381_s25   ;;  %s2178_s24 = sphi %s2253_s24, %s3380_s24  }
   0x9   : > { %s1897_s29 = sadd.s32 4294967294, %s2190_s27   ;;  %s2278_s30 = sadd.s32 1, %s2190_s27  }
   0xa   : > { %3352 = sst [smem:[#allocation12_spill]] %s2278_s30  ;;  %s31_s8 = sadd.s32 1, %s2186_s26 }
   0xb   : > { %s28_s9 = ssub.s32 %s2190_s27, %s2278_s30  ;;  %p38_p0 = scmp.ne.s32.totalorder %s2186_s26, %s2182_s25 }
   0xc   : > { %p29_p1 = scmp.eq.s32.totalorder %s28_s9, 0  ;;  %p39_p2 = scmp.eq.s32.totalorder %s2190_s27, 0 }
   0xd   : > { %p44_p3 = scmp.ne.s32.totalorder %s2182_s25, %s2178_s24  ;;  %p45_p4 = scmp.eq.s32.totalorder %s2274_s28, 0 }
   0xe   : > { %s2290_s10 = scalar_select %p29_p1, %s2186_s26, %s31_s8  }
   0xf   : > { %p2292_p5 = por %p39_p2, %p38_p0  ;;  %p2298_p6 = por %p45_p4, %p44_p3 }
  0x10   : > { %3353 = sst [smem:[#allocation13_spill]] %s2290_s10  ;;  %p194_p7 = scmp.eq.s32.totalorder %s2274_s28, 1 }
  0x11   : > { %p200_p8 = scmp.eq.s32.totalorder %s1897_s29, 1  ;;  %p1898_p9 = scmp.ge.s32.totalorder %s2190_s27, 1 }
  0x12   : > { %p207_p10 = scmp.lt.s32.totalorder %s2190_s27, 3  ;;  %p2305_p11 = por %p194_p7, %p38_p0 }
  0x13   : > { %p2309_p12 = por %p200_p8, %p44_p3  ;;  %s3359_s6 = sld [smem:[#allocation14_spill]] }
  0x14   : > { %p2313_p13 = pnand %p1898_p9, %p207_p10  ;;  %p1965_p2 = scmp.lt.s32.totalorder %s2190_s27, 2 }
  0x15   : > { %s245_s19 = sand.u32 1, %s2186_s26   ;;  %s2192_s22 = smov [#allocation6]  }
  0x16   : > { %p1952_p1 = pneg %p2313_p13  ;;  %p2329_p3 = pnand %p1965_p2, %p2292_p5 }
  0x17   : > { %s1901_s21 = sshll.u32 %s245_s19, 7  ;;  %s1942_s23 = sshll.u32 %s2190_s27, 7 }
  0x18   : > { %p1953_p7 = pnand %p1952_p1, %p45_p4  ;;  %s249_s29 = scalar_lea.vmem [#allocation2], %s1901_s21 }
  0x19   : > { %s234_s18 = sshll.u32 %s3359_s6, 4  ;;  %s257_s8 = sshll.u32 %s249_s29, 4  ;;  %s235_s18 = int_to_ptr.vmem [resolvable:$true] %s234_s18  ;;  %s258_s8 = int_to_ptr.vmem [resolvable:$true] %s257_s8 }
  0x1a   : > { %1955 = dma.vmem_to_smem (!%p1953_p7), %s235_s18, 16, %s2192_s22, [#allocation5]  }
  0x1b   : > { %s254_s17 = scalar_lea.hbm %s3337_s0, %s1942_s23  ;;  %s246_s10 = scalar_lea.sflag [#allocation3], %s245_s19 }
  0x1c   : > { %s255_s6 = sshll.u32 %s254_s17, 4  ;;  %p2094_p8 = pneg %p2329_p3  ;;  %s256_s6 = int_to_ptr.hbm [resolvable:$true] %s255_s6 }
  0x1d   : > { %s2090_s11 = sshra.s32 %s256_s6, 4  ;;  %s2097_s21 = scalar_lea.hbm %s3337_s0, 256  ;;  %s2091_s11 = int_to_ptr.hbm [resolvable:$true] %s2090_s11 }
  0x1e   : > { %s2092_s26 = scalar_lea.hbm %s2091_s11, 128  ;;  %p2098_p1 = scmp.lt.s32.totalorder %s2091_s11, %s3337_s0 }
  0x1f   : > { %p2093_p5 = scmp.ne.s32.totalorder %s2091_s11, %s2092_s26  ;;  %p2099_p2 = scmp.lt.s32.totalorder %s2097_s21, %s2092_s26 }
  0x21   : > { %p2095_p9 = pnand %p2094_p8, %p2093_p5  ;;  %p2100_p7 = por %p2099_p2, %p2098_p1 }
  0x23   : > { %p2096_p10 = pneg %p2095_p9 }
  0x25   : > { %p2101_p0 = pnand %p2100_p7, %p2096_p10 }
  0x27   : > { %2104 = shalt.err (!%p2101_p0)
}
  0x28   : > { %s2193_s19 = smov 512   ;;  %s2194_s23 = smov 32  }
  0x29   : > { %1959 = dma.hbm_to_vmem [thread:$0]  (!%p2329_p3), %s256_s6, 2048, %s258_s8, %s246_s10, %s2193_s19, %s2193_s19, %s2194_s23  }
  0x2a   : > { %269 = sbr.rel (%p2313_p13) target bundleno = 1482 (0x5ca), region = 48  ;;  %s2350_s9 = sand.u32 (!%p2313_p13), 1, %s2182_s25  }
  0x2b   : > { %s1905_s30 = sshll.u32 (!%p2313_p13), %s2350_s9, 7  ;;  %s272_s26 = scalar_lea.sflag (!%p2313_p13), [#allocation3], %s2350_s9 }
  0x2c   : > { %s2356_s16 = scalar_lea.vmem (!%p2313_p13), [#allocation2], %s1905_s30 }
  0x2f   : > { %2165 = dma.done.wait (%p2298_p6), %s272_s26, 2048  }
  0x30   : > { %2167 = vsyncadd (%p2298_p6), %s272_s26, 4294965248 }
  0x31   : > { %2169 = dma.done.wait (%p45_p4), [#allocation5], 16  }
  0x32   : > { %2171 = vsyncadd (%p45_p4), [#allocation5], 4294967280 }
  0x33   : > { %286 = sfence }
  0x34   : > { %v2367_v0 = vld [vmem:[%s2356_s16 + $0x40] sm:$0xff]  ;;  %v2370_v1 = vld [vmem:[%s2356_s16 + $0x48] sm:$0xff]  ;;  %v2373_v2 = vld [vmem:[%s2356_s16 + $0x50] sm:$0xff]  ;;  %v2195_v5 = vmov 1   ;;  %vm3348_vm0 = vcmask 130048   ;;  %vm453_vm1 = vcmask 7168  }
  0x35   : > { %v2376_v3 = vld [vmem:[%s2356_s16 + $0x58] sm:$0xff]  ;;  %2022 = vset.pattern.permute.xlu0 %v2195_v5  ;;  %2023 = vset.pattern.permute.xlu1 %v2195_v5  ;;  %v2384_v10 = vld [vmem:[%s2356_s16] sm:$0xff]  ;;  %v2387_v11 = vld [vmem:[%s2356_s16 + $0x8] sm:$0xff]  ;;  %vm480_vm2 = vcmask 15368   ;;  %s2197_s17 = smov 42   ;;  %s2198_s11 = smov 127  }
  0x36   : > { %v329_v4 = vld [vmem:[%s3338_s1] ss:$8 sm:$0xf]  ;;  %2021 = vset.pattern.permute.xlu2 %v2195_v5  ;;  %v1908_v12 = vld [vmem:[%s3338_s1 + $0x1] ss:$8 sm:$0xf] }
  0x37   : > { %v335_v6 = vperm.slane %v329_v4, 0  ;;  %v336_v7 = vperm.slane %v329_v4, 1  ;;  %v337_v8 = vperm.slane %v329_v4, 2  ;;  %v2381_v9 = vperm.slane %v329_v4, 3  ;;  %v2398_v17 = vld [vmem:[%s2356_s16 + $0x10] sm:$0xff]  ;;  %v2401_v18 = vld [vmem:[%s2356_s16 + $0x18] sm:$0xff] }
  0x38   : > { %v385_v19 = vperm.slane %v1908_v12, 0  ;;  %v386_v20 = vperm.slane %v1908_v12, 1  ;;  %v387_v21 = vperm.slane %v1908_v12, 2  ;;  %v2403_v22 = vperm.slane %v1908_v12, 3  ;;  %v2409_v27 = vld [vmem:[%s2356_s16 + $0x60] sm:$0xff]  ;;  %v2412_v28 = vld [vmem:[%s2356_s16 + $0x68] sm:$0xff] }
  0x39   : > { %v351_v13 = vmul.f32 %v335_v6, %v2367_v0  ;;  %v352_v14 = vmul.f32 %v336_v7, %v2370_v1  ;;  %v353_v15 = vmul.f32 %v337_v8, %v2373_v2  ;;  %v354_v16 = vmul.f32 %v2381_v9, %v2376_v3  ;;  %v2420_v33 = vld [vmem:[%s2356_s16 + $0x70] sm:$0xff]  ;;  %v2426_v38 = vld [vmem:[%s2356_s16 + $0x78] sm:$0xff]  ;;  %v2429_v39 = vld [vmem:[%s2356_s16 + $0x20] sm:$0xff]  ;;  %s2199_s18 = smov 87   ;;  %s2200_s22 = smov 85  }
  0x3a   : > { %v343_v25 = vmul.f32 %v335_v6, %v2384_v10  ;;  %v344_v26 = vmul.f32 %v336_v7, %v2387_v11  ;;  %v393_v29 = vmul.f32 %v385_v19, %v2384_v10  ;;  %v394_v30 = vmul.f32 %v386_v20, %v2387_v11  ;;  %v2435_v44 = vld [vmem:[%s2356_s16 + $0x28] sm:$0xff]  ;;  %v2438_v45 = vld [vmem:[%s2356_s16 + $0x30] sm:$0xff]  ;;  %v2441_v46 = vld [vmem:[%s2356_s16 + $0x38] sm:$0xff]  ;;  %s2201_s21 = smov 88   ;;  %s2202_s29 = smov 84  }
  0x3b   : > { %v372_v23 = vadd.f32 %v352_v14, %v351_v13  ;;  %v374_v24 = vsel %vm3348_vm0, %v354_v16, 0.0  ;;  %v395_v31 = vmul.f32 %v387_v21, %v2398_v17  ;;  %v396_v32 = vmul.f32 %v2403_v22, %v2401_v18  ;;  %s2203_s19 = smov 106   ;;  %s2204_s23 = smov 66  }
  0x3c   : > { %v345_v35 = vmul.f32 %v337_v8, %v2398_v17  ;;  %v346_v36 = vmul.f32 %v2381_v9, %v2401_v18  ;;  %v359_v37 = vadd.f32 %v344_v26, %v343_v25  ;;  %v409_v40 = vadd.f32 %v394_v30, %v393_v29  ;;  %s2205_s26 = smov 126   ;;  %s2206_s6 = smov 46  }
  0x3d   : > { %v373_v34 = vadd.f32 %v372_v23, %v353_v15  ;;  %v411_v41 = vsel %vm3348_vm0, %v396_v32, 0.0  ;;  %v355_v42 = vmul.f32 %v335_v6, %v2409_v27  ;;  %v356_v43 = vmul.f32 %v336_v7, %v2412_v28  ;;  %s1917_s15 = sld [smem:[#allocation6 + $0x4]]  ;;  %s2209_s12 = smov 67  }
  0x3e   : > { %v360_v48 = vadd.f32 %v359_v37, %v345_v35  ;;  %v362_v49 = vsel %vm3348_vm0, %v346_v36, 0.0  ;;  %v357_v50 = vmul.f32 %v337_v8, %v2420_v33  ;;  %v410_v51 = vadd.f32 %v409_v40, %v395_v31  ;;  %s1916_s20 = sld [smem:[#allocation6 + $0x3]] }
  0x3f   : > { %v375_v47 = vadd.f32 %v374_v24, %v373_v34  ;;  %v358_v52 = vmul.f32 %v2381_v9, %v2426_v38  ;;  %v378_v53 = vadd.f32 %v356_v43, %v355_v42  ;;  %v397_v54 = vmul.f32 %v385_v19, %v2429_v39  ;;  %v598_v42 = vld [vmem:[%s3339_s2 + $0x18] sm:$0xff]  ;;  %v597_v43 = vld [vmem:[%s3339_s2 + $0x10] sm:$0xff]  ;;  %s1915_s8 = sld [smem:[#allocation6 + $0x2]] }
  0x40   : > { %v363_v55 = vadd.f32 %v362_v49, %v360_v48  ;;  %v398_v56 = vmul.f32 %v386_v20, %v2435_v44  ;;  %v399_v57 = vmul.f32 %v387_v21, %v2438_v45  ;;  %v400_v58 = vmul.f32 %v2403_v22, %v2441_v46  ;;  %s1919_s10 = sld [smem:[#allocation6 + $0x7]] }
  0x41   : > { %376 = vadd.xlane.f32.xlu1 %v375_v47  ;;  %v412_v59 = vadd.f32 %v411_v41, %v410_v51  ;;  %v379_v60 = vadd.f32 %v378_v53, %v357_v50  ;;  %v380_v61 = vsel %vm3348_vm0, %v358_v52, 0.0  ;;  %v347_v62 = vmul.f32 %v335_v6, %v2429_v39  ;;  %v441_v50 = vld [vmem:[%s3341_s4] sm:$0xff] }
  0x42   : > { %364 = vadd.xlane.f32.xlu0 %v363_v55  ;;  %v415_v63 = vadd.f32 %v398_v56, %v397_v54  ;;  %v417_v4 = vsel %vm3348_vm0, %v400_v58, 0.0  ;;  %v348_v5 = vmul.f32 %v336_v7, %v2435_v44  ;;  %v349_v12 = vmul.f32 %v337_v8, %v2438_v45  ;;  %v433_v52 = vld [vmem:[%s3340_s3] sm:$0xff]  ;;  %v434_v56 = vld [vmem:[%s3340_s3 + $0x8] sm:$0xff] }
  0x43   : > { %413 = vadd.xlane.f32.xlu2 %v412_v59  ;;  %v381_v13 = vadd.f32 %v380_v61, %v379_v60  ;;  %v350_v14 = vmul.f32 %v2381_v9, %v2441_v46  ;;  %v405_v15 = vmul.f32 %v385_v19, %v2409_v27  ;;  %v406_v16 = vmul.f32 %v386_v20, %v2412_v28 }
  0x44   : > { %v416_v23 = vadd.f32 %v415_v63, %v399_v57  ;;  %v366_v24 = vadd.f32 %v348_v5, %v347_v62  ;;  %v407_v6 = vmul.f32 %v387_v21, %v2420_v33  ;;  %v408_v25 = vmul.f32 %v2403_v22, %v2426_v38  ;;  %v442_v57 = vld [vmem:[%s3341_s4 + $0x8] sm:$0xff]  ;;  %v444_v5 = vld [vmem:[%s3341_s4 + $0x18] sm:$0xff] }
  0x45   : > { %v368_v7 = vsel %vm3348_vm0, %v350_v14, 0.0  ;;  %v427_v26 = vadd.f32 %v406_v16, %v405_v15  ;;  %v401_v8 = vmul.f32 %v385_v19, %v2367_v0  ;;  %v402_v29 = vmul.f32 %v386_v20, %v2370_v1  ;;  %v443_v16 = vld [vmem:[%s3341_s4 + $0x10] sm:$0xff] }
  0x46   : > { %v367_v30 = vadd.f32 %v366_v24, %v349_v12  ;;  %v403_v9 = vmul.f32 %v387_v21, %v2373_v2  ;;  %v418_v31 = vadd.f32 %v417_v4, %v416_v23  ;;  %v404_v32 = vmul.f32 %v2403_v22, %v2376_v3  ;;  %v595_v21 = vld [vmem:[%s3339_s2] sm:$0xff]  ;;  %v596_v22 = vld [vmem:[%s3339_s2 + $0x8] sm:$0xff]  ;;  %v435_v12 = vld [vmem:[%s3340_s3 + $0x10] sm:$0xff] }
  0x47   : > { %v421_v34 = vadd.f32 %v402_v29, %v401_v8  ;;  %v428_v36 = vadd.f32 %v427_v26, %v407_v6  ;;  %v429_v37 = vsel %vm3348_vm0, %v408_v25, 0.0  ;;  %v2196_v47 = vmov 0  }
  0x48   : > { %v369_v35 = vadd.f32 %v368_v7, %v367_v30  ;;  %v423_v19 = vsel %vm3348_vm0, %v404_v32, 0.0  ;;  %vm759_vm3 = vcmask 343040   ;;  %vm766_vm4 = vcmask 474112  }
  0x49   : > { %382 = vadd.xlane.f32.xlu1 %v381_v13  ;;  %v422_v40 = vadd.f32 %v421_v34, %v403_v9  ;;  %v430_v41 = vadd.f32 %v429_v37, %v428_v36  ;;  %v436_v13 = vld [vmem:[%s3340_s3 + $0x18] sm:$0xff]  ;;  %vm797_vm5 = vcmask 711680   ;;  %vm817_vm6 = vcmask 695296  }
  0x4a   : > { %370 = vadd.xlane.f32.xlu0 %v369_v35  ;;  %vm839_vm7 = vcmask 719872   ;;  %vm897_vm8 = vcmask 687104   ;;  %vm957_vm9 = vcmask 867328   ;;  %vm1003_vm10 = vcmask 1031168  }
  0x4b   : > { %419 = vadd.xlane.f32.xlu2 %v418_v31  ;;  %v424_v20 = vadd.f32 %v423_v19, %v422_v40  ;;  %vm977_vm11 = vcmask 539648   ;;  %vm1061_vm12 = vcmask 375808   ;;  %vm1147_vm13 = vcmask 875520  }
  0x4c   : > { %vm1206_vm14 = vcmask 859136   ;;  %vm1294_vm15 = vcmask 547840  }
  0x51   : > { %431 = vadd.xlane.f32.xlu1 %v430_v41 }
  0x52   : > { %425 = vadd.xlane.f32.xlu0 %v424_v20 }
  0x63   : > { %676 = vperm.xlu2 %2021, %v595_v21  }
  0x66   : > { %680 = vperm.xlu0 %2022, %v596_v22  }
  0x6a   : > { %688 = vperm.xlu1 %2023, %v598_v42  }
  0x6b   : > { %684 = vperm.xlu2 %2021, %v597_v43  }
  0x6e   : > { %2026 = vset.pattern.permute.xlu0 %v2196_v47 }
  0x6f   : > { %611 = vperm.xlu0 %2026, %v597_v43  }
  0x72   : > { %2025 = vset.pattern.permute.xlu1 %v2196_v47 }
  0x73   : > { %606 = vperm.xlu1 %2025, %v596_v22   ;;  %2024 = vset.pattern.permute.xlu2 %v2196_v47 }
  0x74   : > { %601 = vperm.xlu2 %2024, %v595_v21  }
  0x7c   : > { %616 = vperm.xlu2 %2024, %v598_v42  }
  0xb4   : > { %v377_v48 = vpop.xlane.xlu1 %376 }
  0xb5   : > { %v365_v49 = vpop.xlane.xlu0 %364  ;;  %v439_v25 = vmul.f32 %v435_v12, %v377_v48 }
  0xb6   : > { %v414_v51 = vpop.xlane.xlu2 %413  ;;  %v437_v54 = vmul.f32 %v433_v52, %v365_v49 }
  0xb7   : > { %v445_v53 = vmul.f32 %v441_v50, %v414_v51 }
  0xb9   : > { %v449_v58 = vadd.f32 %v445_v53, %v437_v54 }
  0xbb   : > { %v454_v63 = vsel %vm453_vm1, %v449_v58, 0.0  ;;  %v481_v40 = vsel %vm480_vm2, %v449_v58, 0.0 }
  0xbc   : > { %v383_v55 = vpop.xlane.xlu1 %382 }
  0xbd   : > { %v371_v59 = vpop.xlane.xlu0 %370  ;;  %v440_v7 = vmul.f32 %v436_v13, %v383_v55 }
  0xbe   : > { %v420_v60 = vpop.xlane.xlu2 %419  ;;  %v438_v61 = vmul.f32 %v434_v56, %v371_v59 }
  0xbf   : > { %v446_v62 = vmul.f32 %v442_v57, %v420_v60 }
  0xc1   : > { %v450_v4 = vadd.f32 %v446_v62, %v438_v61 }
  0xc3   : > { %v455_v14 = vsel %vm453_vm1, %v450_v4, 0.0  ;;  %v482_v19 = vsel %vm480_vm2, %v450_v4, 0.0 }
  0xc4   : > { %v432_v15 = vpop.xlane.xlu1 %431  ;;  %v456_v23 = vadd.f32 %v455_v14, %v454_v63  ;;  %v483_v21 = vadd.f32 %v482_v19, %v481_v40 }
  0xc5   : > { %v448_v24 = vmul.f32 %v444_v5, %v432_v15  ;;  %v426_v6 = vpop.xlane.xlu0 %425 }
  0xc6   : > { %v447_v26 = vmul.f32 %v443_v16, %v426_v6  ;;  %v677_v8 = vpop.permute.xlu2 %676 }
  0xc7   : > { %v452_v29 = vadd.f32 %v448_v24, %v440_v7  ;;  %v694_v48 = vmul.f32 %v677_v8, %v2401_v18  ;;  %v692_v57 = vmul.f32 %v677_v8, %v2387_v11  ;;  %v693_v60 = vmul.f32 %v677_v8, %v2398_v17 }
  0xc8   : > { %v451_v30 = vadd.f32 %v447_v26, %v439_v25  ;;  %v691_v63 = vmul.f32 %v677_v8, %v2384_v10 }
  0xc9   : > { %v459_v32 = vsel %vm453_vm1, %v452_v29, 0.0  ;;  %v486_v51 = vsel %vm480_vm2, %v452_v29, 0.0  ;;  %v734_v61 = vsel %vm3348_vm0, %v694_v48, 0.0  ;;  %v2552_v29 = vld [vmem:[%s3342_s5 + $0x8] sm:$0xff] }
  0xca   : > { %v457_v9 = vsel %vm453_vm1, %v451_v30, 0.0  ;;  %v484_v20 = vsel %vm480_vm2, %v451_v30, 0.0  ;;  %vm3349_vm1 = vcmask 531456  }
  0xcb   : > { %v458_v31 = vadd.f32 %v457_v9, %v456_v23  ;;  %v485_v42 = vadd.f32 %v484_v20, %v483_v21 }
  0xcd   : > { %v460_v34 = vadd.f32 %v459_v32, %v458_v31  ;;  %v2521_v53 = vadd.f32 %v486_v51, %v485_v42 }
  0xce   : > { %v2512_v36 = vpop.permute.xlu2 %684 }
  0xcf   : > { %v461_v35 = vrot.slane %v460_v34, 4  ;;  %v702_v58 = vmul.f32 %v2512_v36, %v2376_v3  ;;  %v488_v12 = vrot.slane %v2521_v53, 4  ;;  %v700_v13 = vmul.f32 %v2512_v36, %v2370_v1 }
  0xd0   : > { %v701_v16 = vmul.f32 %v2512_v36, %v2373_v2 }
  0xd1   : > { %v462_v37 = vadd.f32 %v461_v35, %v460_v34  ;;  %v737_v23 = vsel %vm3348_vm0, %v702_v58, 0.0 }
  0xd3   : > { %v463_v41 = vrot.slane %v462_v37, 2 }
  0xd5   : > { %v464_v22 = vadd.f32 %v463_v41, %v462_v37 }
  0xd6   : > { %v602_v50 = vpop.permute.xlu2 %601 }
  0xd7   : > { %v465_v47 = vrot.slane %v464_v22, 1  ;;  %v622_v62 = vmul.f32 %v602_v50, %v2401_v18  ;;  %v619_v18 = vmul.f32 %v602_v50, %v2384_v10  ;;  %v620_v25 = vmul.f32 %v602_v50, %v2387_v11  ;;  %v2557_v10 = vld [vmem:[%s3342_s5] sm:$0xff] }
  0xd8   : > { %v681_v43 = vpop.permute.xlu0 %680  ;;  %v621_v7 = vmul.f32 %v602_v50, %v2398_v17 }
  0xd9   : > { %v698_v49 = vmul.f32 %v681_v43, %v2441_v46  ;;  %v696_v52 = vmul.f32 %v681_v43, %v2435_v44  ;;  %v697_v54 = vmul.f32 %v681_v43, %v2438_v45  ;;  %v466_v59 = vadd.f32 %v465_v47, %v464_v22 }
  0xda   : > { %v695_v6 = vmul.f32 %v681_v43, %v2429_v39  ;;  %v662_v26 = vsel %vm3348_vm0, %v622_v62, 0.0 }
  0xdb   : > { %v735_v55 = vsel %vm3348_vm0, %v698_v49, 0.0  ;;  %v716_v4 = vadd.f32 %v696_v52, %v692_v57  ;;  %v725_v14 = vadd.f32 %v697_v54, %v693_v60  ;;  %v2543_v24 = vmax.f32 %v466_v59, 0.0 }
  0xdc   : > { %v2525_v56 = vpop.permute.xlu1 %688  ;;  %v736_v5 = vadd.f32 %v735_v55, %v734_v61  ;;  %v707_v47 = vadd.f32 %v695_v6, %v691_v63  ;;  %v699_v59 = vmul.f32 %v2512_v36, %v2367_v0  ;;  %v489_v36 = vadd.f32 %v488_v12, %v2521_v53 }
  0xdd   : > { %v706_v15 = vmul.f32 %v2525_v56, %v2426_v38  ;;  %v717_v30 = vadd.f32 %v716_v4, %v700_v13  ;;  %v704_v11 = vmul.f32 %v2525_v56, %v2412_v28  ;;  %v705_v17 = vmul.f32 %v2525_v56, %v2420_v33 }
  0xde   : > { %v738_v9 = vadd.f32 %v737_v23, %v736_v5  ;;  %v726_v31 = vadd.f32 %v725_v14, %v701_v16  ;;  %v617_v34 = vpop.permute.xlu2 %616  ;;  %v2570_v20 = vmul.f32 %v2557_v10, %v2543_v24  ;;  %v2574_v21 = vmul.f32 %v2552_v29, %v2543_v24 }
  0xdf   : > { %v739_v32 = vsel %vm3348_vm0, %v706_v15, 0.0  ;;  %v632_v54 = vmul.f32 %v617_v34, %v2412_v28  ;;  %v634_v60 = vmul.f32 %v617_v34, %v2426_v38  ;;  %v708_v13 = vadd.f32 %v707_v47, %v699_v59  ;;  %v2598_v38 = vld [vmem:[%s3342_s5 + $0x18] sm:$0xff] }
  0xe0   : > { %v740_v48 = vadd.f32 %v739_v32, %v738_v9  ;;  %v703_v14 = vmul.f32 %v2525_v56, %v2409_v27 }
  0xe1   : > { %v612_v8 = vpop.permute.xlu0 %611 }
  0xe2   : > { %v627_v35 = vmul.f32 %v612_v8, %v2367_v0  ;;  %v628_v37 = vmul.f32 %v612_v8, %v2370_v1  ;;  %v629_v19 = vmul.f32 %v612_v8, %v2373_v2  ;;  %v630_v41 = vmul.f32 %v612_v8, %v2376_v3  ;;  %v2593_v0 = vld [vmem:[%s3342_s5 + $0x10] sm:$0xff] }
  0xe3   : > { %v631_v2 = vmul.f32 %v617_v34, %v2409_v27  ;;  %v718_v3 = vadd.f32 %v717_v30, %v704_v11  ;;  %v741_v62 = vrot.slane %v740_v48, 4  ;;  %v667_v27 = vsel %vm3348_vm0, %v634_v60, 0.0 }
  0xe4   : > { %v709_v30 = vadd.f32 %v708_v13, %v703_v14  ;;  %v2606_v9 = vmul.f32 %v2593_v0, %v2543_v24  ;;  %v2610_v11 = vmul.f32 %v2598_v38, %v2543_v24 }
  0xe5   : > { %v607_v40 = vpop.permute.xlu1 %606  ;;  %v719_v61 = vrot.slane %v718_v3, 4 }
  0xe6   : > { %v623_v22 = vmul.f32 %v607_v40, %v2429_v39  ;;  %v624_v42 = vmul.f32 %v607_v40, %v2435_v44  ;;  %v625_v43 = vmul.f32 %v607_v40, %v2438_v45  ;;  %v626_v1 = vmul.f32 %v607_v40, %v2441_v46 }
  0xe7   : > { %v665_v39 = vsel %vm3348_vm0, %v630_v41, 0.0  ;;  %v727_v44 = vadd.f32 %v726_v31, %v705_v17  ;;  %v633_v45 = vmul.f32 %v617_v34, %v2420_v33  ;;  %v720_v56 = vadd.f32 %v719_v61, %v718_v3 }
  0xe8   : > { %v663_v49 = vsel %vm3348_vm0, %v626_v1, 0.0  ;;  %v635_v50 = vadd.f32 %v623_v22, %v619_v18  ;;  %v644_v51 = vadd.f32 %v624_v42, %v620_v25  ;;  %v653_v52 = vadd.f32 %v625_v43, %v621_v7 }
  0xe9   : > { %v664_v55 = vadd.f32 %v663_v49, %v662_v26  ;;  %v728_v15 = vrot.slane %v727_v44, 4  ;;  %v742_v18 = vadd.f32 %v741_v62, %v740_v48  ;;  %v490_v31 = vrot.slane %v489_v36, 2 }
  0xea   : > { %v636_v57 = vadd.f32 %v635_v50, %v627_v35  ;;  %v645_v46 = vadd.f32 %v644_v51, %v628_v37  ;;  %v654_v58 = vadd.f32 %v653_v52, %v629_v19  ;;  %v721_v32 = vrot.slane %v720_v56, 2 }
  0xeb   : > { %v666_v28 = vadd.f32 %v665_v39, %v664_v55  ;;  %v729_v8 = vadd.f32 %v728_v15, %v727_v44  ;;  %v743_v34 = vrot.slane %v742_v18, 2  ;;  %v710_v22 = vrot.slane %v709_v30, 4 }
  0xec   : > { %v637_v63 = vadd.f32 %v636_v57, %v631_v2  ;;  %v646_v4 = vadd.f32 %v645_v46, %v632_v54  ;;  %v655_v5 = vadd.f32 %v654_v58, %v633_v45  ;;  %v491_v47 = vadd.f32 %v490_v31, %v489_v36 }
  0xed   : > { %v668_v26 = vadd.f32 %v667_v27, %v666_v28  ;;  %v730_v41 = vrot.slane %v729_v8, 2  ;;  %v722_v2 = vadd.f32 %v721_v32, %v720_v56  ;;  %v744_v3 = vadd.f32 %v743_v34, %v742_v18 }
  0xee   : > { %v656_v33 = vrot.slane %v655_v5, 4  ;;  %v647_v16 = vrot.slane %v646_v4, 4  ;;  %v638_v23 = vrot.slane %v637_v63, 4  ;;  %v711_v52 = vadd.f32 %v710_v22, %v709_v30 }
  0xef   : > { %v669_v19 = vrot.slane %v668_v26, 4  ;;  %v731_v51 = vadd.f32 %v730_v41, %v729_v8  ;;  %v723_v54 = vrot.slane %v722_v2, 1  ;;  %v745_v55 = vrot.slane %v744_v3, 1 }
  0xf0   : > { %v657_v6 = vadd.f32 %v656_v33, %v655_v5  ;;  %v648_v25 = vadd.f32 %v647_v16, %v646_v4  ;;  %v639_v7 = vadd.f32 %v638_v23, %v637_v63  ;;  %v492_v39 = vrot.slane %v491_v47, 1 }
  0xf1   : > { %v670_v50 = vadd.f32 %v669_v19, %v668_v26  ;;  %v732_v45 = vrot.slane %v731_v51, 1  ;;  %v712_v57 = vrot.slane %v711_v52, 2  ;;  %v2624_v46 = vadd.f32 %v723_v54, %v722_v2 }
  0xf2   : > { %v658_v17 = vrot.slane %v657_v6, 2  ;;  %v649_v53 = vrot.slane %v648_v25, 2  ;;  %v640_v12 = vrot.slane %v639_v7, 2  ;;  %v2626_v58 = vadd.f32 %v745_v55, %v744_v3 }
  0xf3   : > { %v671_v44 = vrot.slane %v670_v50, 2  ;;  %v493_v59 = vadd.f32 %v492_v39, %v491_v47  ;;  %v2628_v61 = vadd.f32 %v732_v45, %v731_v51  ;;  %v713_v62 = vadd.f32 %v712_v57, %v711_v52 }
  0xf4   : > { %v659_v35 = vadd.f32 %v658_v17, %v657_v6  ;;  %v650_v37 = vadd.f32 %v649_v53, %v648_v25  ;;  %v641_v40 = vadd.f32 %v640_v12, %v639_v7 }
  0xf5   : > { %v672_v60 = vadd.f32 %v671_v44, %v670_v50  ;;  %v494_v63 = vmax.f32 %v493_v59, 0.0  ;;  %v714_v5 = vrot.slane %v713_v62, 1 }
  0xf6   : > { %v660_v42 = vrot.slane %v659_v35, 1  ;;  %v651_v43 = vrot.slane %v650_v37, 1  ;;  %v642_v1 = vrot.slane %v641_v40, 1 }
  0xf7   : > { %v673_v4 = vrot.slane %v672_v60, 1  ;;  %v496_v28 = vmul.f32 %v494_v63, %v2552_v29  ;;  %v2639_v14 = vadd.f32 %v714_v5, %v713_v62  ;;  %v497_v15 = vmul.f32 %v494_v63, %v2593_v0 }
  0xf8   : > { %v2612_v24 = vadd.f32 %v660_v42, %v659_v35  ;;  %v2614_v48 = vadd.f32 %v651_v43, %v650_v37  ;;  %v2616_v49 = vadd.f32 %v642_v1, %v641_v40  ;;  %v495_v33 = vmul.f32 %v494_v63, %v2557_v10 }
  0xf9   : > { %v2637_v13 = vadd.f32 %v673_v4, %v672_v60  ;;  %v498_v29 = vmul.f32 %v494_v63, %v2598_v38 }
  0xfa   : > { %755 = vrot.lane.b32.xlu0 %v2612_v24, %s2197_s17  ;;  %753 = vrot.lane.b32.xlu1 %v2614_v48, %s2197_s17 }
  0xfb   : > { %751 = vrot.lane.b32.xlu2 %v2616_v49, %s2197_s17 }
 0x102   : > { %774 = vrot.lane.b32.xlu0 %v2624_v46, %s2197_s17  ;;  %778 = vrot.lane.b32.xlu1 %v2626_v58, %s2197_s17 }
 0x103   : > { %776 = vrot.lane.b32.xlu2 %v2628_v61, %s2197_s17 }
 0x10a   : > { %505 = vrot.lane.b32.xlu0 %v496_v28, %s2198_s11  ;;  %757 = vrot.lane.b32.xlu1 %v2637_v13, %s2197_s17 }
 0x10b   : > { %772 = vrot.lane.b32.xlu2 %v2639_v14, %s2197_s17 }
 0x112   : > { %507 = vrot.lane.b32.xlu1 %v497_v15, %s2198_s11 }
 0x113   : > { %503 = vrot.lane.b32.xlu2 %v495_v33, %s2198_s11 }
 0x11a   : > { %509 = vrot.lane.b32.xlu1 %v498_v29, %s2198_s11  ;;  %s1921_s11 = sld [smem:[#allocation6 + $0x9]] }
 0x155   : > { %v752_v16 = vpop.permute.xlu2 %751 }
 0x156   : > { %v765_v23 = vsel %vm759_vm3, 0.0, %v752_v16 }
 0x157   : > { %789 = vrot.lane.b32.xlu0 %v765_v23, %s2199_s18 }
 0x15d   : > { %v777_v10 = vpop.permute.xlu2 %776 }
 0x165   : > { %v773_v25 = vpop.permute.xlu2 %772 }
 0x166   : > { %v785_v26 = vsel %vm759_vm3, 0.0, %v773_v25 }
 0x16c   : > { %v756_v36 = vpop.permute.xlu0 %755  ;;  %v754_v27 = vpop.permute.xlu1 %753 }
 0x16d   : > { %v761_v56 = vsel %vm759_vm3, %v754_v27, %v756_v36  ;;  %v760_v0 = vsel %vm759_vm3, %v752_v16, %v754_v27  ;;  %v2677_v32 = vpop.permute.xlu2 %503 }
 0x16e   : > { %793 = vrot.lane.b32.xlu1 %v761_v56, %s2199_s18  ;;  %813 = vrot.lane.b32.xlu0 %v761_v56, %s2200_s22 }
 0x16f   : > { %791 = vrot.lane.b32.xlu2 %v760_v0, %s2199_s18 }
 0x174   : > { %v775_v38 = vpop.permute.xlu0 %774  ;;  %v779_v18 = vpop.permute.xlu1 %778 }
 0x175   : > { %v781_v6 = vsel %vm759_vm3, %v775_v38, %v777_v10  ;;  %v780_v30 = vsel %vm759_vm3, %v773_v25, %v775_v38  ;;  %v782_v31 = vsel %vm759_vm3, %v777_v10, %v779_v18 }
 0x176   : > { %811 = vrot.lane.b32.xlu1 %v760_v0, %s2200_s22  ;;  %835 = vrot.lane.b32.xlu0 %v781_v6, %s2201_s21 }
 0x177   : > { %809 = vrot.lane.b32.xlu2 %v765_v23, %s2200_s22 }
 0x17c   : > { %v758_v7 = vpop.permute.xlu1 %757  ;;  %v2679_v35 = vpop.permute.xlu0 %505 }
 0x17d   : > { %v762_v53 = vsel %vm759_vm3, %v756_v36, %v758_v7 }
 0x17e   : > { %855 = vrot.lane.b32.xlu0 %v781_v6, %s2199_s18  ;;  %831 = vrot.lane.b32.xlu1 %v785_v26, %s2201_s21  ;;  %v767_v12 = vsel %vm766_vm4, %v762_v53, 0.0 }
 0x17f   : > { %874 = vrot.lane.b32.xlu2 %v781_v6, %s2200_s22 }
 0x184   : > { %v508_v8 = vpop.permute.xlu1 %507 }
 0x185   : > { %v2663_v17 = vadd.f32 %v508_v8, %v2606_v9  ;;  %v786_v9 = vsel %vm766_vm4, %v782_v31, 0.0 }
 0x186   : > { %851 = vrot.lane.b32.xlu0 %v785_v26, %s2199_s18  ;;  %833 = vrot.lane.b32.xlu1 %v780_v30, %s2201_s21 }
 0x187   : > { %870 = vrot.lane.b32.xlu2 %v785_v26, %s2200_s22 }
 0x18c   : > { %v2681_v40 = vpop.permute.xlu1 %509 }
 0x18e   : > { %872 = vrot.lane.b32.xlu0 %v780_v30, %s2200_s22  ;;  %853 = vrot.lane.b32.xlu1 %v780_v30, %s2199_s18 }
 0x18f   : > { %815 = vrot.lane.b32.xlu2 %v767_v12, %s2200_s22 }
 0x196   : > { %795 = vrot.lane.b32.xlu0 %v767_v12, %s2199_s18  ;;  %893 = vrot.lane.b32.xlu1 %v781_v6, %s2202_s29 }
 0x197   : > { %837 = vrot.lane.b32.xlu2 %v786_v9, %s2201_s21  ;;  %s1920_s21 = sld [smem:[#allocation6 + $0x8]] }
 0x19e   : > { %895 = vrot.lane.b32.xlu0 %v786_v9, %s2202_s29  ;;  %876 = vrot.lane.b32.xlu1 %v786_v9, %s2200_s22 }
 0x19f   : > { %857 = vrot.lane.b32.xlu2 %v786_v9, %s2199_s18 }
 0x1a6   : > { %889 = vrot.lane.b32.xlu1 %v785_v26, %s2202_s29 }
 0x1a7   : > { %891 = vrot.lane.b32.xlu2 %v780_v30, %s2202_s29  ;;  %s1918_s29 = sld [smem:[#allocation6 + $0x5]] }
 0x1c9   : > { %v792_v34 = vpop.permute.xlu2 %791  ;;  %v790_v19 = vpop.permute.xlu0 %789 }
 0x1ca   : > { %v798_v1 = vsel %vm797_vm5, %v790_v19, %v792_v34 }
 0x1cb   : > { %v805_v2 = vadd.f32 %v798_v1, %v2616_v49 }
 0x1d1   : > { %v810_v37 = vpop.permute.xlu2 %809 }
 0x1d9   : > { %v875_v41 = vpop.permute.xlu2 %874 }
 0x1e0   : > { %v794_v22 = vpop.permute.xlu1 %793  ;;  %v814_v42 = vpop.permute.xlu0 %813 }
 0x1e1   : > { %v2683_v43 = vpop.permute.xlu2 %870  ;;  %v799_v47 = vsel %vm797_vm5, %v792_v34, %v794_v22 }
 0x1e2   : > { %v806_v3 = vadd.f32 %v799_v47, %v2614_v48 }
 0x1e8   : > { %v812_v50 = vpop.permute.xlu1 %811  ;;  %v836_v51 = vpop.permute.xlu0 %835 }
 0x1e9   : > { %v818_v52 = vsel %vm817_vm6, %v810_v37, %v812_v50  ;;  %v819_v54 = vsel %vm817_vm6, %v812_v50, %v814_v42  ;;  %v816_v55 = vpop.permute.xlu2 %815 }
 0x1ea   : > { %v2691_v39 = vadd.f32 %v818_v52, %v805_v2  ;;  %v2693_v44 = vadd.f32 %v819_v54, %v806_v3  ;;  %v820_v25 = vsel %vm817_vm6, %v814_v42, %v816_v55 }
 0x1ec   : > { %915 = vrot.lane.b32.xlu2 %v2693_v44, %s2197_s17  ;;  %913 = vrot.lane.b32.xlu0 %v2691_v39, %s2197_s17 }
 0x1f0   : > { %v856_v45 = vpop.permute.xlu0 %855  ;;  %v832_v57 = vpop.permute.xlu1 %831 }
 0x1f1   : > { %v838_v59 = vpop.permute.xlu2 %837 }
 0x1f2   : > { %v842_v7 = vsel %vm839_vm7, %v836_v51, %v838_v59  ;;  %v850_v30 = vadd.f32 %v838_v59, %v2626_v58 }
 0x1f3   : > { %v849_v12 = vadd.f32 %v842_v7, %v2628_v61 }
 0x1f8   : > { %v852_v60 = vpop.permute.xlu0 %851  ;;  %v834_v62 = vpop.permute.xlu1 %833 }
 0x1f9   : > { %v858_v63 = vpop.permute.xlu2 %857  ;;  %v841_v4 = vsel %vm839_vm7, %v834_v62, %v836_v51  ;;  %v840_v31 = vsel %vm839_vm7, %v832_v57, %v834_v62 }
 0x1fa   : > { %v848_v33 = vadd.f32 %v841_v4, %v2624_v46  ;;  %v861_v53 = vsel %vm797_vm5, %v856_v45, %v858_v63  ;;  %v869_v9 = vadd.f32 %v858_v63, %v850_v30  ;;  %v847_v47 = vadd.f32 %v840_v31, %v2639_v14 }
 0x1fb   : > { %v868_v34 = vadd.f32 %v861_v53, %v849_v12 }
 0x200   : > { %v873_v5 = vpop.permute.xlu0 %872  ;;  %v854_v28 = vpop.permute.xlu1 %853 }
 0x201   : > { %v860_v15 = vsel %vm797_vm5, %v854_v28, %v856_v45  ;;  %v879_v16 = vsel %vm817_vm6, %v873_v5, %v875_v41  ;;  %v892_v23 = vpop.permute.xlu2 %891 }
 0x202   : > { %v867_v29 = vadd.f32 %v860_v15, %v848_v33 }
 0x204   : > { %v886_v56 = vadd.f32 %v879_v16, %v867_v29 }
 0x208   : > { %v796_v36 = vpop.permute.xlu0 %795  ;;  %v894_v27 = vpop.permute.xlu1 %893 }
 0x209   : > { %v800_v0 = vsel %vm797_vm5, %v794_v22, %v796_v36  ;;  %v808_v10 = vadd.f32 %v796_v36, %v2637_v13  ;;  %v899_v38 = vsel %vm897_vm8, %v892_v23, %v894_v27  ;;  %v859_v22 = vsel %vm797_vm5, %v852_v60, %v854_v28 }
 0x20a   : > { %v807_v18 = vadd.f32 %v800_v0, %v2612_v24  ;;  %v2707_v6 = vadd.f32 %v899_v38, %v886_v56  ;;  %v866_v51 = vadd.f32 %v859_v22, %v847_v47 }
 0x20b   : > { %v2711_v26 = vadd.f32 %v816_v55, %v808_v10 }
 0x20c   : > { %934 = vrot.lane.b32.xlu0 %v2707_v6, %s2197_s17  ;;  %v2715_v8 = vadd.f32 %v820_v25, %v807_v18 }
 0x20d   : > { %919 = vrot.lane.b32.xlu1 %v2711_v26, %s2197_s17 }
 0x20e   : > { %917 = vrot.lane.b32.xlu2 %v2715_v8, %s2197_s17 }
 0x210   : > { %v896_v37 = vpop.permute.xlu0 %895  ;;  %v877_v19 = vpop.permute.xlu1 %876 }
 0x211   : > { %v880_v42 = vsel %vm817_vm6, %v875_v41, %v877_v19  ;;  %v888_v1 = vadd.f32 %v877_v19, %v869_v9  ;;  %v900_v3 = vsel %vm897_vm8, %v894_v27, %v896_v37  ;;  %v878_v41 = vsel %vm817_vm6, %v2683_v43, %v873_v5 }
 0x212   : > { %v887_v2 = vadd.f32 %v880_v42, %v868_v34  ;;  %v885_v55 = vadd.f32 %v878_v41, %v866_v51 }
 0x213   : > { %v2729_v50 = vadd.f32 %v896_v37, %v888_v1 }
 0x214   : > { %v2731_v52 = vadd.f32 %v900_v3, %v887_v2 }
 0x215   : > { %938 = vrot.lane.b32.xlu1 %v2729_v50, %s2197_s17 }
 0x216   : > { %936 = vrot.lane.b32.xlu2 %v2731_v52, %s2197_s17 }
 0x218   : > { %v890_v54 = vpop.permute.xlu1 %889 }
 0x219   : > { %v898_v45 = vsel %vm897_vm8, %v890_v54, %v892_v23 }
 0x21a   : > { %v2740_v57 = vadd.f32 %v898_v45, %v885_v55 }
 0x21c   : > { %932 = vrot.lane.b32.xlu0 %v2740_v57, %s2197_s17 }
 0x246   : > { %v916_v59 = vpop.permute.xlu2 %915 }
 0x25e   : > { %v914_v60 = vpop.permute.xlu0 %913 }
 0x25f   : > { %v926_v62 = vsel %vm759_vm3, 0.0, %v914_v60  ;;  %v921_v63 = vsel %vm759_vm3, %v914_v60, %v916_v59 }
 0x260   : > { %949 = vrot.lane.b32.xlu1 %v926_v62, %s2203_s19  ;;  %971 = vrot.lane.b32.xlu2 %v921_v63, %s2204_s23 }
 0x261   : > { %951 = vrot.lane.b32.xlu0 %v921_v63, %s2203_s19 }
 0x268   : > { %v918_v43 = vpop.permute.xlu2 %917 }
 0x269   : > { %969 = vrot.lane.b32.xlu0 %v926_v62, %s2204_s23  ;;  %v922_v4 = vsel %vm759_vm3, %v916_v59, %v918_v43 }
 0x26a   : > { %973 = vrot.lane.b32.xlu1 %v922_v4, %s2204_s23  ;;  %953 = vrot.lane.b32.xlu2 %v922_v4, %s2203_s19 }
 0x270   : > { %v937_v29 = vpop.permute.xlu2 %936 }
 0x27e   : > { %v935_v33 = vpop.permute.xlu0 %934 }
 0x27f   : > { %v920_v5 = vpop.permute.xlu1 %919  ;;  %v941_v16 = vsel %vm759_vm3, %v935_v33, %v937_v29 }
 0x280   : > { %v923_v28 = vsel %vm759_vm3, %v918_v43, %v920_v5 }
 0x281   : > { %v927_v15 = vsel %vm766_vm4, %v923_v28, 0.0 }
 0x282   : > { %955 = vrot.lane.b32.xlu1 %v927_v15, %s2203_s19  ;;  %975 = vrot.lane.b32.xlu2 %v927_v15, %s2204_s23 }
 0x287   : > { %v939_v56 = vpop.permute.xlu1 %938 }
 0x288   : > { %v942_v0 = vsel %vm759_vm3, %v937_v29, %v939_v56 }
 0x289   : > { %v946_v10 = vsel %vm766_vm4, %v942_v0, 0.0 }
 0x28a   : > { %1019 = vrot.lane.b32.xlu2 %v941_v16, %s2203_s19 }
 0x28e   : > { %v933_v23 = vpop.permute.xlu0 %932 }
 0x28f   : > { %v940_v36 = vsel %vm759_vm3, %v933_v23, %v935_v33  ;;  %v945_v27 = vsel %vm759_vm3, 0.0, %v933_v23  ;;  %v2799_v23 = vld [vmem:[%s3338_s1 + $0x2] ss:$8 sm:$0xf] }
 0x290   : > { %995 = vrot.lane.b32.xlu0 %v945_v27, %s2205_s26  ;;  %997 = vrot.lane.b32.xlu1 %v940_v36, %s2205_s26 }
 0x292   : > { %1057 = vrot.lane.b32.xlu2 %v941_v16, %s2206_s6 }
 0x298   : > { %1017 = vrot.lane.b32.xlu0 %v940_v36, %s2203_s19  ;;  %1015 = vrot.lane.b32.xlu1 %v945_v27, %s2203_s19 }
 0x29a   : > { %1001 = vrot.lane.b32.xlu2 %v946_v10, %s2205_s26 }
 0x2a0   : > { %1034 = vrot.lane.b32.xlu0 %v945_v27, %s2204_s23  ;;  %1036 = vrot.lane.b32.xlu1 %v940_v36, %s2204_s23 }
 0x2a2   : > { %1040 = vrot.lane.b32.xlu2 %v946_v10, %s2204_s23 }
 0x2a8   : > { %1021 = vrot.lane.b32.xlu1 %v946_v10, %s2203_s19  ;;  %999 = vrot.lane.b32.xlu0 %v941_v16, %s2205_s26  ;;  %s2207_s26 = smov 105  }
 0x2aa   : > { %1053 = vrot.lane.b32.xlu2 %v945_v27, %s2206_s6 }
 0x2b0   : > { %1059 = vrot.lane.b32.xlu1 %v946_v10, %s2206_s6  ;;  %1038 = vrot.lane.b32.xlu0 %v941_v16, %s2204_s23 }
 0x2b8   : > { %1055 = vrot.lane.b32.xlu0 %v940_v36, %s2206_s6  ;;  %s2208_s6 = smov 107  }
 0x2ba   : > { %v2770_v38 = vpop.permute.xlu2 %971 }
 0x2c4   : > { %v954_v25 = vpop.permute.xlu2 %953 }
 0x2d2   : > { %v950_v18 = vpop.permute.xlu1 %949 }
 0x2d3   : > { %v952_v7 = vpop.permute.xlu0 %951 }
 0x2db   : > { %v970_v12 = vpop.permute.xlu0 %969 }
 0x2dc   : > { %v2772_v30 = vpop.permute.xlu1 %973  ;;  %v976_v53 = vpop.permute.xlu2 %975  ;;  %v978_v29 = vsel %vm977_vm11, %v970_v12, %v2770_v38  ;;  %v1093_v12 = vperm.slane %v2799_v23, 3 }
 0x2dd   : > { %v980_v43 = vsel %vm977_vm11, %v2772_v30, %v976_v53 }
 0x2e4   : > { %v2774_v9 = vpop.permute.xlu2 %1019 }
 0x2ec   : > { %v2776_v42 = vpop.permute.xlu2 %1057 }
 0x2f4   : > { %v956_v31 = vpop.permute.xlu1 %955  ;;  %v1002_v2 = vpop.permute.xlu2 %1001 }
 0x2f5   : > { %v968_v3 = vadd.f32 %v956_v31, %v2711_v26  ;;  %v960_v51 = vsel %vm957_vm9, %v954_v25, %v956_v31  ;;  %v1014_v55 = vadd.f32 %v1002_v2, %v2729_v50  ;;  %v1079_v26 = vadd.f32 %v2628_v61, %v2612_v24 }
 0x2f6   : > { %v967_v59 = vadd.f32 %v960_v51, %v2715_v8  ;;  %v958_v50 = vsel %vm957_vm9, %v950_v18, %v952_v7  ;;  %v1080_v8 = vadd.f32 %v2626_v58, %v2637_v13 }
 0x2f7   : > { %v988_v60 = vadd.f32 %v976_v53, %v968_v3  ;;  %v965_v56 = vadd.f32 %v958_v50, %v2691_v39 }
 0x2f8   : > { %v987_v4 = vadd.f32 %v980_v43, %v967_v59 }
 0x2f9   : > { %v992_v5 = vmul.f32 0.11111111, %v988_v60  ;;  %v985_v31 = vadd.f32 %v978_v29, %v965_v56 }
 0x2fa   : > { %v991_v0 = vmul.f32 0.11111111, %v987_v4 }
 0x2fb   : > { %v1084_v10 = vsub.f32 %v1080_v8, %v992_v5 }
 0x2fc   : > { %v1041_v28 = vpop.permute.xlu2 %1040 }
 0x302   : > { %v996_v34 = vpop.permute.xlu0 %995  ;;  %v998_v37 = vpop.permute.xlu1 %997 }
 0x303   : > { %v1004_v36 = vsel %vm1003_vm10, %v996_v34, %v998_v37 }
 0x304   : > { %v1011_v34 = vadd.f32 %v1004_v36, %v2740_v57  ;;  %v1054_v59 = vpop.permute.xlu2 %1053  ;;  %v2856_v36 = vstv %s1916_s20  ;;  %s2210_s20 = smov 65  }
 0x30a   : > { %v1018_v19 = vpop.permute.xlu0 %1017  ;;  %v1016_v22 = vpop.permute.xlu1 %1015 }
 0x30b   : > { %v1024_v57 = vsel %vm957_vm9, %v1018_v19, %v2774_v9 }
 0x312   : > { %v1035_v1 = vpop.permute.xlu0 %1034  ;;  %v1037_v47 = vpop.permute.xlu1 %1036 }
 0x313   : > { %v1042_v39 = vsel %vm977_vm11, %v1035_v1, %v1037_v47  ;;  %v989_v1 = vmul.f32 0.11111111, %v985_v31 }
 0x31a   : > { %v1022_v41 = vpop.permute.xlu1 %1021  ;;  %v1000_v54 = vpop.permute.xlu0 %999 }
 0x31b   : > { %v1006_v45 = vsel %vm1003_vm10, %v1000_v54, %v1002_v2  ;;  %v1033_v62 = vadd.f32 %v1022_v41, %v1014_v55  ;;  %v1025_v15 = vsel %vm957_vm9, %v2774_v9, %v1022_v41  ;;  %v1005_v27 = vsel %vm1003_vm10, %v998_v37, %v1000_v54 }
 0x31c   : > { %v1013_v63 = vadd.f32 %v1006_v45, %v2731_v52  ;;  %v959_v52 = vsel %vm957_vm9, %v952_v7, %v954_v25  ;;  %v1023_v25 = vsel %vm957_vm9, %v1016_v22, %v1018_v19  ;;  %v1012_v37 = vadd.f32 %v1005_v27, %v2707_v6 }
 0x31d   : > { %v1052_v33 = vadd.f32 %v1041_v28, %v1033_v62  ;;  %v966_v3 = vadd.f32 %v959_v52, %v2693_v44  ;;  %v1083_v41 = vsub.f32 %v1079_v26, %v991_v0  ;;  %v1030_v54 = vadd.f32 %v1023_v25, %v1011_v34 }
 0x31e   : > { %v1032_v61 = vadd.f32 %v1025_v15, %v1013_v63  ;;  %v1092_v55 = vperm.slane %v2799_v23, 2  ;;  %v979_v45 = vsel %vm977_vm11, %v2770_v38, %v2772_v30  ;;  %v1031_v62 = vadd.f32 %v1024_v57, %v1012_v37 }
 0x31f   : > { %v1049_v60 = vadd.f32 %v1042_v39, %v1030_v54  ;;  %v1077_v26 = vadd.f32 %v2639_v14, %v2616_v49  ;;  %v986_v9 = vadd.f32 %v979_v45, %v966_v3  ;;  %v1090_v49 = vperm.slane %v2799_v23, 0 }
 0x320   : > { %v1078_v15 = vadd.f32 %v2624_v46, %v2614_v48  ;;  %v2858_v27 = vstv %s1915_s8  ;;  %v2868_v0 = vstv %s1921_s11  ;;  %v1248_v37 = vstv %s1919_s10  ;;  %s1914_s8 = sld [smem:[#allocation6 + $0x6]] }
 0x321   : > { %v1081_v5 = vsub.f32 %v1077_v26, %v989_v1  ;;  %v990_v14 = vmul.f32 0.11111111, %v986_v9  ;;  %s1926_s11 = sld [smem:[#allocation6 + $0xd]] }
 0x322   : > { %v1060_v16 = vpop.permute.xlu1 %1059  ;;  %v1039_v24 = vpop.permute.xlu0 %1038  ;;  %s1929_s10 = sld [smem:[#allocation6 + $0x11]] }
 0x323   : > { %v1072_v58 = vadd.f32 %v1060_v16, %v1052_v33  ;;  %v1044_v13 = vsel %vm977_vm11, %v1039_v24, %v1041_v28  ;;  %v1064_v7 = vsel %vm1061_vm12, %v2776_v42, %v1060_v16  ;;  %v1043_v6 = vsel %vm977_vm11, %v1037_v47, %v1039_v24 }
 0x324   : > { %v1051_v18 = vadd.f32 %v1044_v13, %v1032_v61  ;;  %v1050_v19 = vadd.f32 %v1043_v6, %v1031_v62  ;;  %v1082_v52 = vsub.f32 %v1078_v15, %v990_v14  ;;  %v1091_v16 = vperm.slane %v2799_v23, 1 }
 0x325   : > { %v1076_v53 = vmul.f32 0.04, %v1072_v58  ;;  %v1189_v61 = vstv %s1917_s15  ;;  %s1922_s15 = sld [smem:[#allocation6 + $0xa]] }
 0x326   : > { %v1071_v2 = vadd.f32 %v1064_v7, %v1051_v18  ;;  %v1219_v7 = vstv %s1918_s29  ;;  %s1924_s29 = sld [smem:[#allocation6 + $0xb]] }
 0x327   : > { %v1088_v51 = vsub.f32 %v1084_v10, %v1076_v53  ;;  %v2870_v10 = vstv %s1920_s21  ;;  %s1925_s21 = sld [smem:[#allocation6 + $0xc]] }
 0x328   : > { %v1075_v22 = vmul.f32 0.04, %v1071_v2 }
 0x329   : > { %v2822_v44 = vmul.f32 %v1093_v12, %v1088_v51 }
 0x32a   : > { %v1056_v63 = vpop.permute.xlu0 %1055  ;;  %v1087_v43 = vsub.f32 %v1083_v41, %v1075_v22 }
 0x32b   : > { %v1062_v38 = vsel %vm1061_vm12, %v1054_v59, %v1056_v63  ;;  %v1063_v30 = vsel %vm1061_vm12, %v1056_v63, %v2776_v42  ;;  %1112 = vrot.lane.b32.xlu2 %v2822_v44, %s2197_s17 }
 0x32c   : > { %v1069_v47 = vadd.f32 %v1062_v38, %v1049_v60  ;;  %v2833_v4 = vmul.f32 %v1092_v55, %v1087_v43  ;;  %v1070_v28 = vadd.f32 %v1063_v30, %v1050_v19  ;;  %v1336_v19 = vstv %s1922_s15  ;;  %s1928_s15 = sld [smem:[#allocation6 + $0x10]] }
 0x32e   : > { %v1073_v50 = vmul.f32 0.04, %v1069_v47  ;;  %1110 = vrot.lane.b32.xlu0 %v2833_v4, %s2197_s17  ;;  %v1074_v8 = vmul.f32 0.04, %v1070_v28 }
 0x330   : > { %v1085_v42 = vsub.f32 %v1081_v5, %v1073_v50  ;;  %v1086_v29 = vsub.f32 %v1082_v52, %v1074_v8 }
 0x332   : > { %v2842_v33 = vmul.f32 %v1090_v49, %v1085_v42  ;;  %v2849_v24 = vmul.f32 %v1091_v16, %v1086_v29 }
 0x334   : > { %1106 = vrot.lane.b32.xlu1 %v2842_v33, %s2197_s17 }
 0x33c   : > { %1108 = vrot.lane.b32.xlu1 %v2849_v24, %s2197_s17 }
 0x385   : > { %v1113_v62 = vpop.permute.xlu2 %1112 }
 0x3a0   : > { %v1111_v22 = vpop.permute.xlu0 %1110 }
 0x3a1   : > { %v1116_v43 = vsel %vm759_vm3, %v1111_v22, %v1113_v62 }
 0x3a2   : > { %v1122_v26 = vsel %vm766_vm4, %v1116_v43, 0.0 }
 0x3a3   : > { %v1193_v38 = vmul.f32 %v1189_v61, %v1122_v26  ;;  %v1223_v47 = vmul.f32 %v1219_v7, %v1122_v26  ;;  %v1252_v50 = vmul.f32 %v1248_v37, %v1122_v26  ;;  %v1164_v14 = vmul.f32 %v2856_v36, %v1122_v26 }
 0x3a4   : > { %v1134_v42 = vmul.f32 %v2858_v27, %v1122_v26  ;;  %v1340_v15 = vmul.f32 %v1336_v19, %v1122_v26  ;;  %v1311_v8 = vmul.f32 %v2868_v0, %v1122_v26  ;;  %v1281_v52 = vmul.f32 %v2870_v10, %v1122_v26 }
 0x3a6   : > { %v1107_v48 = vpop.permute.xlu1 %1106 }
 0x3a7   : > { %v2854_v46 = vsel %vm759_vm3, 0.0, %v1107_v48 }
 0x3a8   : > { %v1190_v58 = vmul.f32 %v1189_v61, %v2854_v46  ;;  %v1161_v13 = vmul.f32 %v2856_v36, %v2854_v46  ;;  %v1131_v56 = vmul.f32 %v2858_v27, %v2854_v46  ;;  %v1308_v18 = vmul.f32 %v2868_v0, %v2854_v46 }
 0x3a9   : > { %v1278_v25 = vmul.f32 %v2870_v10, %v2854_v46  ;;  %v1220_v53 = vmul.f32 %v1219_v7, %v2854_v46  ;;  %v1249_v39 = vmul.f32 %v1248_v37, %v2854_v46 }
 0x3aa   : > { %1198 = vrot.lane.b32.xlu1 %v1190_v58, %s2207_s26  ;;  %1169 = vrot.lane.b32.xlu2 %v1161_v13, %s2203_s19  ;;  %v1124_v58 = vstv %s1914_s8  ;;  %s1927_s8 = sld [smem:[#allocation6 + $0xe]] }
 0x3ab   : > { %1139 = vrot.lane.b32.xlu0 %v1131_v56, %s2208_s6 }
 0x3ae   : > { %v1109_v31 = vpop.permute.xlu1 %1108 }
 0x3af   : > { %v1114_v34 = vsel %vm759_vm3, %v1107_v48, %v1109_v31  ;;  %v1115_v45 = vsel %vm759_vm3, %v1109_v31, %v1111_v22  ;;  %v1337_v48 = vmul.f32 %v1336_v19, %v2854_v46 }
 0x3b0   : > { %v1162_v2 = vmul.f32 %v2856_v36, %v1114_v34  ;;  %v1132_v3 = vmul.f32 %v2858_v27, %v1114_v34  ;;  %v1279_v51 = vmul.f32 %v2870_v10, %v1114_v34  ;;  %v1250_v41 = vmul.f32 %v1248_v37, %v1114_v34 }
 0x3b1   : > { %v1191_v54 = vmul.f32 %v1189_v61, %v1114_v34  ;;  %v1133_v57 = vmul.f32 %v2858_v27, %v1115_v45  ;;  %v1192_v6 = vmul.f32 %v1189_v61, %v1115_v45  ;;  %v1221_v1 = vmul.f32 %v1219_v7, %v1114_v34 }
 0x3b2   : > { %1316 = vrot.lane.b32.xlu1 %v1308_v18, %s2204_s23  ;;  %1286 = vrot.lane.b32.xlu2 %v1278_v25, %s2209_s12  ;;  %v1280_v59 = vmul.f32 %v2870_v10, %v1115_v45  ;;  %v1222_v60 = vmul.f32 %v1219_v7, %v1115_v45  ;;  %v1309_v63 = vmul.f32 %v2868_v0, %v1114_v34 }
 0x3b3   : > { %1228 = vrot.lane.b32.xlu0 %v1220_v53, %s2199_s18  ;;  %v1251_v30 = vmul.f32 %v1248_v37, %v1115_v45  ;;  %v1163_v9 = vmul.f32 %v2856_v36, %v1115_v45  ;;  %v1339_v5 = vmul.f32 %v1336_v19, %v1115_v45  ;;  %v1310_v28 = vmul.f32 %v2868_v0, %v1115_v45 }
 0x3b4   : > { %v1338_v29 = vmul.f32 %v1336_v19, %v1114_v34  ;;  %v1125_v10 = vmul.f32 %v1124_v58, %v2842_v33 }
 0x3ba   : > { %1171 = vrot.lane.b32.xlu1 %v1162_v2, %s2203_s19  ;;  %1141 = vrot.lane.b32.xlu2 %v1132_v3, %s2208_s6 }
 0x3bb   : > { %1257 = vrot.lane.b32.xlu0 %v1249_v39, %s2200_s22 }
 0x3c2   : > { %1288 = vrot.lane.b32.xlu1 %v1279_v51, %s2209_s12  ;;  %1259 = vrot.lane.b32.xlu2 %v1250_v41, %s2200_s22 }
 0x3c3   : > { %1200 = vrot.lane.b32.xlu0 %v1191_v54, %s2207_s26 }
 0x3ca   : > { %1143 = vrot.lane.b32.xlu1 %v1133_v57, %s2208_s6  ;;  %1202 = vrot.lane.b32.xlu2 %v1192_v6, %s2207_s26 }
 0x3cb   : > { %1230 = vrot.lane.b32.xlu0 %v1221_v1, %s2199_s18 }
 0x3d2   : > { %1290 = vrot.lane.b32.xlu1 %v1280_v59, %s2209_s12  ;;  %1232 = vrot.lane.b32.xlu2 %v1222_v60, %s2199_s18 }
 0x3d3   : > { %1318 = vrot.lane.b32.xlu0 %v1309_v63, %s2204_s23 }
 0x3da   : > { %1204 = vrot.lane.b32.xlu1 %v1193_v38, %s2207_s26  ;;  %1261 = vrot.lane.b32.xlu2 %v1251_v30, %s2200_s22 }
 0x3db   : > { %1173 = vrot.lane.b32.xlu0 %v1163_v9, %s2203_s19 }
 0x3e2   : > { %1234 = vrot.lane.b32.xlu1 %v1223_v47, %s2199_s18  ;;  %1349 = vrot.lane.b32.xlu2 %v1339_v5, %s2210_s20  ;;  %v1126_v47 = vmul.f32 %v1124_v58, %v2849_v24 }
 0x3e3   : > { %1320 = vrot.lane.b32.xlu0 %v1310_v28, %s2204_s23 }
 0x3ea   : > { %1263 = vrot.lane.b32.xlu1 %v1252_v50, %s2200_s22  ;;  %1175 = vrot.lane.b32.xlu2 %v1164_v14, %s2203_s19 }
 0x3eb   : > { %1145 = vrot.lane.b32.xlu0 %v1134_v42, %s2208_s6 }
 0x3f2   : > { %1351 = vrot.lane.b32.xlu1 %v1340_v15, %s2210_s20  ;;  %1322 = vrot.lane.b32.xlu2 %v1311_v8, %s2204_s23 }
 0x3f3   : > { %1292 = vrot.lane.b32.xlu0 %v1281_v52, %s2209_s12 }
 0x3fa   : > { %1347 = vrot.lane.b32.xlu2 %v1338_v29, %s2210_s20 }
 0x3fb   : > { %1345 = vrot.lane.b32.xlu0 %v1337_v48, %s2210_s20 }
 0x404   : > { %v1170_v61 = vpop.permute.xlu2 %1169 }
 0x40c   : > { %v1287_v36 = vpop.permute.xlu2 %1286 }
 0x414   : > { %v1142_v27 = vpop.permute.xlu2 %1141 }
 0x41c   : > { %v1260_v13 = vpop.permute.xlu2 %1259  ;;  %v1199_v56 = vpop.permute.xlu1 %1198 }
 0x41d   : > { %v1140_v0 = vpop.permute.xlu0 %1139 }
 0x41e   : > { %v1148_v18 = vsel %vm1147_vm13, %v1140_v0, %v1142_v27 }
 0x41f   : > { %v1155_v25 = vadd.f32 %v1148_v18, %v1125_v10 }
 0x424   : > { %v2926_v7 = vpop.permute.xlu2 %1202  ;;  %v1317_v46 = vpop.permute.xlu1 %1316 }
 0x425   : > { %v1229_v53 = vpop.permute.xlu0 %1228 }
 0x42c   : > { %v2928_v31 = vpop.permute.xlu2 %1232  ;;  %v1172_v34 = vpop.permute.xlu1 %1171 }
 0x42d   : > { %v1258_v37 = vpop.permute.xlu0 %1257  ;;  %v1177_v2 = vsel %vm957_vm9, %v1170_v61, %v1172_v34 }
 0x42e   : > { %v1184_v3 = vadd.f32 %v1177_v2, %v1155_v25  ;;  %v1265_v59 = vsel %vm817_vm6, %v1258_v37, %v1260_v13 }
 0x434   : > { %v2931_v39 = vpop.permute.xlu2 %1261  ;;  %v1289_v51 = vpop.permute.xlu1 %1288 }
 0x435   : > { %v1201_v41 = vpop.permute.xlu0 %1200  ;;  %v1295_v62 = vsel %vm1294_vm15, %v1287_v36, %v1289_v51  ;;  %v1266_v61 = vsel %vm817_vm6, %v1260_v13, %v2931_v39  ;;  %v1127_v13 = vmul.f32 %v1124_v58, %v2833_v4 }
 0x436   : > { %v1207_v33 = vsel %vm1206_vm14, %v1199_v56, %v1201_v41  ;;  %v1208_v8 = vsel %vm1206_vm14, %v1201_v41, %v2926_v7 }
 0x437   : > { %v1214_v54 = vadd.f32 %v1207_v33, %v1184_v3 }
 0x43c   : > { %v2934_v22 = vpop.permute.xlu2 %1349  ;;  %v1144_v45 = vpop.permute.xlu1 %1143 }
 0x43d   : > { %v1231_v57 = vpop.permute.xlu0 %1230  ;;  %v1149_v19 = vsel %vm1147_vm13, %v1142_v27, %v1144_v45 }
 0x43e   : > { %v1236_v6 = vsel %vm797_vm5, %v1229_v53, %v1231_v57  ;;  %v1156_v28 = vadd.f32 %v1149_v19, %v1126_v47  ;;  %v1237_v29 = vsel %vm797_vm5, %v1231_v57, %v2928_v31 }
 0x43f   : > { %v1243_v1 = vadd.f32 %v1236_v6, %v1214_v54 }
 0x441   : > { %v1272_v60 = vadd.f32 %v1265_v59, %v1243_v1 }
 0x443   : > { %v1302_v63 = vadd.f32 %v1295_v62, %v1272_v60 }
 0x444   : > { %v1176_v43 = vpop.permute.xlu2 %1175  ;;  %v1291_v26 = vpop.permute.xlu1 %1290 }
 0x445   : > { %v1319_v38 = vpop.permute.xlu0 %1318  ;;  %v1296_v56 = vsel %vm1294_vm15, %v1289_v51, %v1291_v26 }
 0x446   : > { %v1324_v30 = vsel %vm977_vm11, %v1317_v46, %v1319_v38 }
 0x447   : > { %v1331_v9 = vadd.f32 %v1324_v30, %v1302_v63 }
 0x44c   : > { %v1205_v5 = vpop.permute.xlu1 %1204  ;;  %v1323_v14 = vpop.permute.xlu2 %1322 }
 0x44d   : > { %v1174_v50 = vpop.permute.xlu0 %1173 }
 0x44e   : > { %v1178_v42 = vsel %vm957_vm9, %v1172_v34, %v1174_v50  ;;  %v1128_v34 = vmul.f32 %v1124_v58, %v2822_v44  ;;  %v1179_v57 = vsel %vm957_vm9, %v1174_v50, %v1176_v43  ;;  %v1209_v44 = vsel %vm1206_vm14, %v2926_v7, %v1205_v5 }
 0x44f   : > { %v1185_v15 = vadd.f32 %v1178_v42, %v1156_v28 }
 0x451   : > { %v1215_v52 = vadd.f32 %v1208_v8, %v1185_v15 }
 0x453   : > { %v1244_v48 = vadd.f32 %v1237_v29, %v1215_v52 }
 0x454   : > { %v1235_v27 = vpop.permute.xlu1 %1234  ;;  %v1348_v10 = vpop.permute.xlu2 %1347 }
 0x455   : > { %v1321_v36 = vpop.permute.xlu0 %1320  ;;  %v1273_v24 = vadd.f32 %v1266_v61, %v1244_v48  ;;  %v1355_v46 = vsel %vm3349_vm1, %v1348_v10, %v2934_v22 }
 0x456   : > { %v1325_v18 = vsel %vm977_vm11, %v1319_v38, %v1321_v36  ;;  %v1326_v7 = vsel %vm977_vm11, %v1321_v36, %v1323_v14 }
 0x457   : > { %v1303_v0 = vadd.f32 %v1296_v56, %v1273_v24  ;;  %v3007_v56 = vstv %s1928_s15 }
 0x459   : > { %v1332_v25 = vadd.f32 %v1325_v18, %v1303_v0  ;;  %v3009_v0 = vstv %s1927_s8 }
 0x45b   : > { %v1362_v53 = vadd.f32 %v1355_v46, %v1332_v25 }
 0x45c   : > { %v1264_v33 = vpop.permute.xlu1 %1263 }
 0x45d   : > { %v1366_v37 = vmax.f32 %v1362_v53, 0.0  ;;  %v1146_v2 = vpop.permute.xlu0 %1145 }
 0x45e   : > { %v1150_v3 = vsel %vm1147_vm13, %v1144_v45, %v1146_v2  ;;  %v1158_v41 = vadd.f32 %v1146_v2, %v1128_v34  ;;  %v1238_v45 = vsel %vm797_vm5, %v2928_v31, %v1235_v27 }
 0x45f   : > { %v1157_v51 = vadd.f32 %v1150_v3, %v1127_v13  ;;  %v2958_v54 = vmul.f32 %v1366_v37, %v1091_v16  ;;  %v1267_v16 = vsel %vm817_vm6, %v2931_v39, %v1264_v33 }
 0x460   : > { %v1187_v6 = vadd.f32 %v1176_v43, %v1158_v41  ;;  %v515_v41 = vadd.f32 %v2677_v32, %v2570_v20  ;;  %v518_v20 = vadd.f32 %v2681_v40, %v2610_v11 }
 0x461   : > { %v1186_v1 = vadd.f32 %v1179_v57, %v1157_v51  ;;  %1379 = vrot.lane.b32.xlu1 %v2958_v54, %s2197_s17 }
 0x462   : > { %v1217_v4 = vadd.f32 %v1205_v5, %v1187_v6  ;;  %v1913_v11 = vmul.f32 -1.442695, %v518_v20 }
 0x463   : > { %v1216_v58 = vadd.f32 %v1209_v44, %v1186_v1  ;;  %v1910_v1 = vmul.f32 -1.442695, %v515_v41 }
 0x464   : > { %v1246_v59 = vadd.f32 %v1235_v27, %v1217_v4  ;;  %v1352_v47 = vpop.permute.xlu1 %1351  ;;  %v3005_v27 = vstv %s1929_s10 }
 0x465   : > { %v1245_v60 = vadd.f32 %v1238_v45, %v1216_v58  ;;  %v1293_v62 = vpop.permute.xlu0 %1292  ;;  %v1356_v31 = vsel %vm3349_vm1, %v2934_v22, %v1352_v47  ;;  %2027 = vpow2.f32 %v1910_v1  ;;  %v516_v58 = vadd.f32 %v2679_v35, %v2574_v21 }
 0x466   : > { %v1275_v63 = vadd.f32 %v1264_v33, %v1246_v59  ;;  %v1297_v38 = vsel %vm1294_vm15, %v1291_v26, %v1293_v62  ;;  %v1912_v59 = vmul.f32 -1.442695, %v2663_v17 }
 0x467   : > { %v1274_v43 = vadd.f32 %v1267_v16, %v1245_v60  ;;  %v1911_v40 = vmul.f32 -1.442695, %v516_v58 }
 0x468   : > { %v1305_v30 = vadd.f32 %v1293_v62, %v1275_v63  ;;  %2029 = vpow2.f32 %v1912_v59 }
 0x469   : > { %v1304_v19 = vadd.f32 %v1297_v38, %v1274_v43  ;;  %2031 = vpow2.f32 %v1913_v11 }
 0x46a   : > { %v1334_v5 = vadd.f32 %v1323_v14, %v1305_v30  ;;  %2033 = vpow2.f32 %v1911_v40 }
 0x46b   : > { %v1333_v28 = vadd.f32 %v1326_v7, %v1304_v19  ;;  %v2028_v60 = vpop.eup %2027 }
 0x46c   : > { %v1364_v50 = vadd.f32 %v1352_v47, %v1334_v5  ;;  %v3063_v35 = vadd.f32 1.0, %v2028_v60 }
 0x46d   : > { %v1363_v42 = vadd.f32 %v1356_v31, %v1333_v28  ;;  %v1346_v15 = vpop.permute.xlu0 %1345 }
 0x46e   : > { %v1368_v8 = vmax.f32 %v1364_v50, 0.0  ;;  %v1354_v39 = vsel %vm3349_vm1, %v1346_v15, %v1348_v10  ;;  %v2030_v17 = vpop.eup %2029  ;;  %2035 = vrcp.f32 %v3063_v35 }
 0x46f   : > { %v1367_v52 = vmax.f32 %v1363_v42, 0.0  ;;  %v1361_v29 = vadd.f32 %v1354_v39, %v1331_v9  ;;  %v2996_v9 = vstv %s1924_s29  ;;  %v2032_v63 = vpop.eup %2031  ;;  %v3071_v30 = vadd.f32 1.0, %v2030_v17 }
 0x470   : > { %v2976_v26 = vmul.f32 %v1368_v8, %v1093_v12  ;;  %v2992_v12 = vstv %s1926_s11  ;;  %s1930_s11 = sld [smem:[#allocation6 + $0x12]]  ;;  %v2034_v43 = vpop.eup %2033  ;;  %v3077_v7 = vadd.f32 1.0, %v2032_v63 }
 0x471   : > { %v1365_v48 = vmax.f32 %v1361_v29, 0.0  ;;  %v2980_v14 = vmul.f32 %v1367_v52, %v1092_v55  ;;  %v2994_v55 = vstv %s1925_s21  ;;  %v3081_v28 = vadd.f32 1.0, %v2034_v43  ;;  %s1797_s21 = scalar_lea.sflag [#allocation4], %s2350_s9 }
 0x472   : > { %1383 = vrot.lane.b32.xlu0 %v2976_v26, %s2197_s17  ;;  %2037 = vrcp.f32 %v3071_v30  ;;  %v591_v58 = vand.u32 2147483648, %v3077_v7  ;;  %v589_v11 = vand.u32 2147483647, %v3077_v7  ;;  %v574_v60 = vand.u32 2147483647, %v3071_v30 }
 0x473   : > { %1381 = vrot.lane.b32.xlu1 %v2980_v14, %s2197_s17  ;;  %v2988_v22 = vmul.f32 %v1365_v48, %v1090_v49  ;;  %2039 = vrcp.f32 %v3077_v7 }
 0x474   : > { %v2036_v50 = vpop.eup %2035  ;;  %2041 = vrcp.f32 %v3081_v28  ;;  %v592_v43 = vor.u32 1.1754944e-38, %v591_v58 }
 0x475   : > { %1377 = vrot.lane.b32.xlu2 %v2988_v22, %s2197_s17  ;;  %s1931_s17 = sld [smem:[#allocation6 + $0x13]]  ;;  %v536_v15 = vmul.f32 %v2036_v50, %v3063_v35  ;;  %vm541_vm2 = vweird.f32 %v2036_v50 }
 0x476   : > { %v3022_v37 = vstv %s1930_s11 }
 0x477   : > { %v537_v48 = vsub.f32 1.0, %v536_v15 }
 0x478   : > { %v3100_v29 = vpop.eup %2037 }
 0x479   : > { %vm571_vm8 = vweird.f32 %v3100_v29 }
 0x47b   : > { %v3020_v34 = vstv %s1931_s17  ;;  %s2140_s17 = scalar_lea.hbm %s3344_s7, 256 }
 0x4cf   : > { %v1378_v61 = vpop.permute.xlu2 %1377 }
 0x4d0   : > { %v1392_v23 = vsel %vm759_vm3, 0.0, %v1378_v61 }
 0x4d1   : > { %v1460_v49 = vmul.f32 %v2992_v12, %v1392_v23  ;;  %v1431_v36 = vmul.f32 %v2994_v55, %v1392_v23  ;;  %v1402_v24 = vmul.f32 %v2996_v9, %v1392_v23  ;;  %v1547_v10 = vmul.f32 %v3005_v27, %v1392_v23 }
 0x4d2   : > { %v1518_v18 = vmul.f32 %v3007_v56, %v1392_v23  ;;  %v1489_v25 = vmul.f32 %v3009_v0, %v1392_v23  ;;  %v1605_v13 = vmul.f32 %v3020_v34, %v1392_v23  ;;  %v1576_v3 = vmul.f32 %v3022_v37, %v1392_v23 }
 0x4d3   : > { %1468 = vrot.lane.b32.xlu1 %v1460_v49, %s2207_s26  ;;  %1439 = vrot.lane.b32.xlu2 %v1431_v36, %s2203_s19  ;;  %v1380_v46 = vpop.permute.xlu1 %1379 }
 0x4d4   : > { %1410 = vrot.lane.b32.xlu0 %v1402_v24, %s2208_s6  ;;  %v3018_v53 = vsel %vm759_vm3, %v1378_v61, %v1380_v46  ;;  %v3104_v61 = vpop.eup %2039 }
 0x4d5   : > { %v1432_v2 = vmul.f32 %v2994_v55, %v3018_v53  ;;  %v1519_v51 = vmul.f32 %v3007_v56, %v3018_v53  ;;  %v1403_v33 = vmul.f32 %v2996_v9, %v3018_v53  ;;  %v1461_v57 = vmul.f32 %v2992_v12, %v3018_v53  ;;  %v3107_v23 = vpop.eup %2041 }
 0x4d6   : > { %v1490_v4 = vmul.f32 %v3009_v0, %v3018_v53  ;;  %v1548_v45 = vmul.f32 %v3005_v27, %v3018_v53  ;;  %v1577_v21 = vmul.f32 %v3022_v37, %v3018_v53  ;;  %v581_v49 = vmul.f32 %v3104_v61, %v3077_v7 }
 0x4d7   : > { %v551_v36 = vmul.f32 %v3107_v23, %v3081_v28  ;;  %vm556_vm10 = vweird.f32 %v3107_v23  ;;  %vm586_vm12 = vweird.f32 %v3104_v61 }
 0x4db   : > { %1555 = vrot.lane.b32.xlu1 %v1547_v10, %s2209_s12  ;;  %1526 = vrot.lane.b32.xlu2 %v1518_v18, %s2200_s22 }
 0x4dc   : > { %1497 = vrot.lane.b32.xlu0 %v1489_v25, %s2199_s18 }
 0x4e3   : > { %1613 = vrot.lane.b32.xlu2 %v1605_v13, %s2210_s20  ;;  %1441 = vrot.lane.b32.xlu1 %v1432_v2, %s2203_s19  ;;  %v552_v2 = vsub.f32 1.0, %v551_v36 }
 0x4e4   : > { %1584 = vrot.lane.b32.xlu0 %v1576_v3, %s2204_s23  ;;  %v1384_v38 = vpop.permute.xlu0 %1383 }
 0x4e5   : > { %v1382_v6 = vpop.permute.xlu1 %1381 }
 0x4e6   : > { %v3043_v44 = vsel %vm759_vm3, %v1380_v46, %v1382_v6  ;;  %v1387_v31 = vsel %vm759_vm3, %v1382_v6, %v1384_v38  ;;  %v582_v46 = vsub.f32 1.0, %v581_v49  ;;  %vm540_vm3 = vweird.f32 %v3063_v35 }
 0x4e7   : > { %v1404_v32 = vmul.f32 %v2996_v9, %v3043_v44  ;;  %v1491_v62 = vmul.f32 %v3009_v0, %v3043_v44  ;;  %v1433_v16 = vmul.f32 %v2994_v55, %v3043_v44  ;;  %v1578_v19 = vmul.f32 %v3022_v37, %v3043_v44 }
 0x4e8   : > { %v1462_v47 = vmul.f32 %v2992_v12, %v3043_v44  ;;  %v1520_v5 = vmul.f32 %v3007_v56, %v3043_v44  ;;  %v3090_v42 = vsel %vm766_vm4, %v1387_v31, 0.0  ;;  %v1549_v39 = vmul.f32 %v3005_v27, %v3043_v44  ;;  %vm542_vm4 = vmor %vm540_vm3, %vm541_vm2 }
 0x4e9   : > { %v1463_v8 = vmul.f32 %v2992_v12, %v3090_v42  ;;  %v1405_v52 = vmul.f32 %v2996_v9, %v3090_v42  ;;  %v566_v12 = vmul.f32 %v3100_v29, %v3071_v30  ;;  %v538_v9 = vmul.f32 %v2036_v50, %v537_v48 }
 0x4ea   : > { %v1550_v24 = vmul.f32 %v3005_v27, %v3090_v42  ;;  %v1434_v10 = vmul.f32 %v2994_v55, %v3090_v42  ;;  %v1492_v18 = vmul.f32 %v3009_v0, %v3090_v42  ;;  %v546_v27 = vand.u32 2147483648, %v3063_v35 }
 0x4eb   : > { %1528 = vrot.lane.b32.xlu1 %v1519_v51, %s2200_s22  ;;  %1412 = vrot.lane.b32.xlu2 %v1403_v33, %s2208_s6  ;;  %v567_v25 = vsub.f32 1.0, %v566_v12  ;;  %v539_v13 = vadd.f32 %v2036_v50, %v538_v9  ;;  %v544_v55 = vand.u32 2147483647, %v3063_v35  ;;  %v583_v0 = vmul.f32 %v3104_v61, %v582_v46 }
 0x4ec   : > { %1470 = vrot.lane.b32.xlu0 %v1461_v57, %s2207_s26  ;;  %v547_v51 = vor.u32 1.1754944e-38, %v546_v27  ;;  %v553_v33 = vmul.f32 %v3107_v23, %v552_v2  ;;  %v1606_v57 = vmul.f32 %v3020_v34, %v3018_v53  ;;  %v1521_v6 = vmul.f32 %v3007_v56, %v3090_v42 }
 0x4ed   : > { %v543_v3 = vsel %vm542_vm4, %v2036_v50, %v539_v13  ;;  %v568_v41 = vmul.f32 %v3100_v29, %v567_v25  ;;  %vm545_vm7 = vcmp.eq.f32.partialorder %v544_v55, 8.507059e+37  ;;  %v1579_v20 = vmul.f32 %v3022_v37, %v3090_v42 }
 0x4ee   : > { %v584_v53 = vadd.f32 %v3104_v61, %v583_v0  ;;  %v554_v37 = vadd.f32 %v3107_v23, %v553_v33  ;;  %vm570_vm2 = vweird.f32 %v3071_v30  ;;  %vm585_vm3 = vweird.f32 %v3077_v7 }
 0x4ef   : > { %v569_v56 = vadd.f32 %v3100_v29, %v568_v41  ;;  %vm3153_vm4 = vmor %vm570_vm2, %vm571_vm8  ;;  %vm590_vm8 = vcmp.eq.f32.partialorder %v589_v11, 8.507059e+37 }
 0x4f0   : > { %vm587_vm0 = vmor %vm585_vm3, %vm586_vm12 }
 0x4f1   : > { %v588_v35 = vsel %vm587_vm0, %v3104_v61, %v584_v53 }
 0x4f2   : > { %v593_v7 = vsel %vm590_vm8, %v592_v43, %v588_v35 }
 0x4f3   : > { %1414 = vrot.lane.b32.xlu1 %v1404_v32, %s2208_s6  ;;  %1499 = vrot.lane.b32.xlu2 %v1490_v4, %s2199_s18  ;;  %v548_v32 = vsel %vm545_vm7, %v547_v51, %v543_v3  ;;  %v561_v4 = vand.u32 2147483648, %v3081_v28  ;;  %vm555_vm7 = vweird.f32 %v3081_v28 }
 0x4f4   : > { %1557 = vrot.lane.b32.xlu0 %v1548_v45, %s2209_s12  ;;  %v576_v45 = vand.u32 2147483648, %v3071_v30  ;;  %vm3162_vm1 = vmor %vm555_vm7, %vm556_vm10  ;;  %vm575_vm10 = vcmp.eq.f32.partialorder %v574_v60, 8.507059e+37 }
 0x4f5   : > { %v558_v17 = vsel %vm3162_vm1, %v3107_v23, %v554_v37  ;;  %v562_v63 = vor.u32 1.1754944e-38, %v561_v4 }
 0x4f6   : > { %v577_v38 = vor.u32 1.1754944e-38, %v576_v45 }
 0x4fb   : > { %1501 = vrot.lane.b32.xlu1 %v1491_v62, %s2199_s18  ;;  %1586 = vrot.lane.b32.xlu2 %v1577_v21, %s2204_s23  ;;  %v559_v62 = vand.u32 2147483647, %v3081_v28 }
 0x4fc   : > { %1443 = vrot.lane.b32.xlu0 %v1433_v16, %s2203_s19  ;;  %v573_v16 = vsel %vm3153_vm4, %v3100_v29, %v569_v56 }
 0x4fd   : > { %vm560_vm0 = vcmp.eq.f32.partialorder %v559_v62, 8.507059e+37 }
 0x4fe   : > { %v563_v28 = vsel %vm560_vm0, %v562_v63, %v558_v17 }
 0x503   : > { %1588 = vrot.lane.b32.xlu1 %v1578_v19, %s2204_s23  ;;  %1472 = vrot.lane.b32.xlu2 %v1462_v47, %s2207_s26  ;;  %v1608_v19 = vmul.f32 %v3020_v34, %v3090_v42  ;;  %v1607_v47 = vmul.f32 %v3020_v34, %v3043_v44 }
 0x504   : > { %1530 = vrot.lane.b32.xlu0 %v1520_v5, %s2200_s22  ;;  %v578_v5 = vsel %vm575_vm10, %v577_v38, %v573_v16 }
 0x50b   : > { %1474 = vrot.lane.b32.xlu1 %v1463_v8, %s2207_s26  ;;  %1559 = vrot.lane.b32.xlu2 %v1549_v39, %s2209_s12  ;;  %s1708_s26 = sld [smem:[#allocation6]] }
 0x50c   : > { %1416 = vrot.lane.b32.xlu0 %v1405_v52, %s2208_s6 }
 0x511   : > { %v1710_v1 = vstv %s1708_s26 }
 0x512   : > { %v1711_v59 = vmul.f32 %v1710_v1, %v548_v32  ;;  %v1714_v31 = vmul.f32 %v1710_v1, %v593_v7  ;;  %v1713_v50 = vmul.f32 %v1710_v1, %v578_v5  ;;  %v1712_v15 = vmul.f32 %v1710_v1, %v563_v28 }
 0x513   : > { %1561 = vrot.lane.b32.xlu1 %v1550_v24, %s2209_s12  ;;  %1445 = vrot.lane.b32.xlu2 %v1434_v10, %s2203_s19  ;;  %s3263_s19 = scalar_lea.vmem [#allocation7], %s1905_s30  ;;  %s1943_s30 = sshll.u32 %s2274_s28, 7 }
 0x514   : > { %1503 = vrot.lane.b32.xlu0 %v1492_v18, %s2199_s18  ;;  %v1715_v30 = vadd.f32 1.0, %v1711_v59  ;;  %v1718_v8 = vadd.f32 1.0, %v1714_v31  ;;  %v1717_v39 = vadd.f32 1.0, %v1713_v50  ;;  %v1716_v42 = vadd.f32 1.0, %v1712_v15  ;;  %s1923_s18 = sld [smem:[#allocation6 + $0xf]]  ;;  %s1808_s6 = scalar_lea.hbm %s3344_s7, %s1943_s30 }
 0x515   : > { %s1809_s12 = sshll.u32 %s3263_s19, 4  ;;  %s1810_s12 = int_to_ptr.vmem [resolvable:$true] %s1809_s12 }
 0x51a   : > { %v1395_v49 = vstv %s1923_s18 }
 0x51b   : > { %1615 = vrot.lane.b32.xlu1 %v1606_v57, %s2210_s20  ;;  %1532 = vrot.lane.b32.xlu2 %v1521_v6, %s2200_s22  ;;  %v1396_v36 = vmul.f32 %v1395_v49, %v2988_v22  ;;  %v1399_v58 = vmul.f32 %v1395_v49, %v2976_v26  ;;  %v1397_v62 = vmul.f32 %v1395_v49, %v2958_v54  ;;  %s1936_s22 = sld [smem:[#allocation6 + $0x1]] }
 0x51c   : > { %1590 = vrot.lane.b32.xlu0 %v1579_v20, %s2204_s23  ;;  %v1398_v21 = vmul.f32 %v1395_v49, %v2980_v14 }
 0x523   : > { %1726 = vperm.xlu1 %2025, %v1715_v30   ;;  %1619 = vrot.lane.b32.xlu2 %v1608_v19, %s2210_s20 }
 0x524   : > { %1617 = vrot.lane.b32.xlu0 %v1607_v47, %s2210_s20  ;;  %s1811_s20 = sshll.u32 %s1808_s6, 4  ;;  %s1812_s20 = int_to_ptr.hbm [resolvable:$true] %s1811_s20 }
 0x525   : > { %s2134_s29 = sshra.s32 %s1812_s20, 4  ;;  %s2135_s29 = int_to_ptr.hbm [resolvable:$true] %s2134_s29 }
 0x526   : > { %s2136_s10 = scalar_lea.hbm %s2135_s29, 128  ;;  %p2141_p0 = scmp.lt.s32.totalorder %s2135_s29, %s3344_s7 }
 0x527   : > { %p2137_p4 = scmp.ne.s32.totalorder %s2135_s29, %s2136_s10  ;;  %p2142_p3 = scmp.lt.s32.totalorder %s2140_s17, %s2136_s10 }
 0x529   : > { %p2138_p6 = pnand %p2137_p4, %p2305_p11  ;;  %p2143_p5 = por %p2142_p3, %p2141_p0 }
 0x52b   : > { %1741 = vperm.xlu1 %2025, %v1718_v8   ;;  %1736 = vperm.xlu2 %2024, %v1717_v39   ;;  %p2139_p13 = pneg %p2138_p6 }
 0x52c   : > { %1731 = vperm.xlu0 %2026, %v1716_v42  }
 0x52d   : > { %v1440_v52 = vpop.permute.xlu2 %1439  ;;  %p2144_p8 = pnand %p2143_p5, %p2139_p13 }
 0x535   : > { %v1527_v34 = vpop.permute.xlu2 %1526 }
 0x53d   : > { %v3179_v44 = vpop.permute.xlu2 %1613 }
 0x545   : > { %v1469_v29 = vpop.permute.xlu1 %1468  ;;  %v1413_v61 = vpop.permute.xlu2 %1412 }
 0x546   : > { %v1411_v48 = vpop.permute.xlu0 %1410 }
 0x547   : > { %v1418_v9 = vsel %vm1147_vm13, %v1411_v48, %v1413_v61 }
 0x548   : > { %v1425_v10 = vadd.f32 %v1418_v9, %v1396_v36 }
 0x54d   : > { %v1556_v23 = vpop.permute.xlu1 %1555  ;;  %v1500_v24 = vpop.permute.xlu2 %1499 }
 0x54e   : > { %v1498_v12 = vpop.permute.xlu0 %1497 }
 0x54f   : > { %v1505_v41 = vsel %vm797_vm5, %v1498_v12, %v1500_v24 }
 0x555   : > { %v1442_v18 = vpop.permute.xlu1 %1441  ;;  %v3184_v27 = vpop.permute.xlu2 %1586 }
 0x556   : > { %v1585_v25 = vpop.permute.xlu0 %1584  ;;  %v1447_v46 = vsel %vm957_vm9, %v1440_v52, %v1442_v18 }
 0x557   : > { %v1454_v13 = vadd.f32 %v1447_v46, %v1425_v10 }
 0x55d   : > { %v1529_v2 = vpop.permute.xlu1 %1528  ;;  %v1473_v1 = vpop.permute.xlu2 %1472 }
 0x55e   : > { %v1471_v55 = vpop.permute.xlu0 %1470  ;;  %v1534_v33 = vsel %vm817_vm6, %v1527_v34, %v1529_v2  ;;  %v1592_v34 = vsel %vm977_vm11, %v1585_v25, %v3184_v27 }
 0x55f   : > { %v1476_v3 = vsel %vm1206_vm14, %v1469_v29, %v1471_v55  ;;  %v1477_v28 = vsel %vm1206_vm14, %v1471_v55, %v1473_v1 }
 0x560   : > { %v1483_v0 = vadd.f32 %v1476_v3, %v1454_v13 }
 0x562   : > { %v1512_v51 = vadd.f32 %v1505_v41, %v1483_v0 }
 0x564   : > { %v1541_v22 = vadd.f32 %v1534_v33, %v1512_v51 }
 0x565   : > { %v1415_v57 = vpop.permute.xlu1 %1414  ;;  %v1560_v4 = vpop.permute.xlu2 %1559 }
 0x566   : > { %v1558_v6 = vpop.permute.xlu0 %1557  ;;  %v1419_v11 = vsel %vm1147_vm13, %v1413_v61, %v1415_v57 }
 0x567   : > { %v1426_v17 = vadd.f32 %v1419_v11, %v1397_v62  ;;  %v1563_v19 = vsel %vm1294_vm15, %v1556_v23, %v1558_v6 }
 0x568   : > { %v1570_v14 = vadd.f32 %v1563_v19, %v1541_v22 }
 0x56a   : > { %v1599_v12 = vadd.f32 %v1592_v34, %v1570_v14 }
 0x56d   : > { %v1502_v20 = vpop.permute.xlu1 %1501  ;;  %v1446_v37 = vpop.permute.xlu2 %1445 }
 0x56e   : > { %v1444_v32 = vpop.permute.xlu0 %1443  ;;  %v1506_v42 = vsel %vm797_vm5, %v1500_v24, %v1502_v20 }
 0x56f   : > { %v1448_v35 = vsel %vm957_vm9, %v1442_v18, %v1444_v32  ;;  %v1449_v38 = vsel %vm957_vm9, %v1444_v32, %v1446_v37  ;;  %vm3365_vm9 = vcmask 531456  }
 0x570   : > { %v1455_v43 = vadd.f32 %v1448_v35, %v1426_v17 }
 0x572   : > { %v1484_v31 = vadd.f32 %v1477_v28, %v1455_v43 }
 0x574   : > { %v1513_v29 = vadd.f32 %v1506_v42, %v1484_v31  ;;  %v3223_v31 = vstv %s1936_s22 }
 0x575   : > { %v1589_v53 = vpop.permute.xlu1 %1588  ;;  %v1533_v47 = vpop.permute.xlu2 %1532 }
 0x576   : > { %v1531_v56 = vpop.permute.xlu0 %1530 }
 0x577   : > { %v1535_v52 = vsel %vm817_vm6, %v1529_v2, %v1531_v56  ;;  %v1536_v10 = vsel %vm817_vm6, %v1531_v56, %v1533_v47  ;;  %v1564_v2 = vsel %vm1294_vm15, %v1558_v6, %v1560_v4 }
 0x578   : > { %v1542_v49 = vadd.f32 %v1535_v52, %v1513_v29 }
 0x57a   : > { %v1571_v3 = vadd.f32 %v1564_v2, %v1542_v49 }
 0x57d   : > { %v1475_v45 = vpop.permute.xlu1 %1474  ;;  %v1620_v24 = vpop.permute.xlu2 %1619 }
 0x57e   : > { %v1417_v59 = vpop.permute.xlu0 %1416  ;;  %v1478_v50 = vsel %vm1206_vm14, %v1473_v1, %v1475_v45 }
 0x57f   : > { %v1420_v40 = vsel %vm1147_vm13, %v1415_v57, %v1417_v59  ;;  %v1428_v60 = vadd.f32 %v1417_v59, %v1399_v58 }
 0x580   : > { %v1427_v63 = vadd.f32 %v1420_v40, %v1398_v21 }
 0x581   : > { %v1457_v16 = vadd.f32 %v1446_v37, %v1428_v60 }
 0x582   : > { %v1456_v7 = vadd.f32 %v1449_v38, %v1427_v63 }
 0x583   : > { %v1486_v26 = vadd.f32 %v1475_v45, %v1457_v16 }
 0x584   : > { %v1485_v39 = vadd.f32 %v1478_v50, %v1456_v7 }
 0x585   : > { %v1562_v30 = vpop.permute.xlu1 %1561 }
 0x586   : > { %v1504_v5 = vpop.permute.xlu0 %1503  ;;  %v1565_v0 = vsel %vm1294_vm15, %v1560_v4, %v1562_v30 }
 0x587   : > { %v1515_v54 = vadd.f32 %v1504_v5, %v1486_v26  ;;  %v1507_v15 = vsel %vm797_vm5, %v1502_v20, %v1504_v5  ;;  %vm3366_vm5 = vmmov %vm3365_vm9 }
 0x588   : > { %v1514_v48 = vadd.f32 %v1507_v15, %v1485_v39  ;;  %vm3367_vm6 = vmmov %vm3366_vm5 }
 0x589   : > { %v1544_v8 = vadd.f32 %v1533_v47, %v1515_v54 }
 0x58a   : > { %v1543_v13 = vadd.f32 %v1536_v10, %v1514_v48  ;;  %v2072_v10 = vld [vmem:[%s2356_s16 + $0x30] sm:$0xff] }
 0x58b   : > { %v1573_v61 = vadd.f32 %v1562_v30, %v1544_v8 }
 0x58c   : > { %v1572_v33 = vadd.f32 %v1565_v0, %v1543_v13 }
 0x58d   : > { %v1616_v23 = vpop.permute.xlu1 %1615 }
 0x58e   : > { %v1591_v9 = vpop.permute.xlu0 %1590  ;;  %v1621_v36 = vsel %vm3365_vm9, %v3179_v44, %v1616_v23  ;;  %v1593_v44 = vsel %vm977_vm11, %v3184_v27, %v1589_v53 }
 0x58f   : > { %v1602_v18 = vadd.f32 %v1591_v9, %v1573_v61  ;;  %v1628_v46 = vadd.f32 %v1621_v36, %v1599_v12  ;;  %v1594_v41 = vsel %vm977_vm11, %v1589_v53, %v1591_v9  ;;  %v1600_v22 = vadd.f32 %v1593_v44, %v1571_v3 }
 0x590   : > { %v1601_v57 = vadd.f32 %v1594_v41, %v1572_v33 }
 0x591   : > { %v1631_v55 = vadd.f32 %v1620_v24, %v1602_v18  ;;  %v1932_v25 = vmul.f32 -1.442695, %v1628_v46 }
 0x593   : > { %v1935_v51 = vmul.f32 -1.442695, %v1631_v55  ;;  %2043 = vpow2.f32 %v1932_v25 }
 0x595   : > { %2045 = vpow2.f32 %v1935_v51  ;;  %v3220_v47 = vpop.permute.xlu1 %1726 }
 0x596   : > { %v1618_v1 = vpop.permute.xlu0 %1617 }
 0x597   : > { %v1622_v20 = vsel %vm3366_vm5, %v1616_v23, %v1618_v1  ;;  %v1623_v6 = vsel %vm3367_vm6, %v1618_v1, %v1620_v24  ;;  %v1737_v24 = vpop.permute.xlu2 %1736 }
 0x598   : > { %v1629_v32 = vadd.f32 %v1622_v20, %v1600_v22  ;;  %v1630_v56 = vadd.f32 %v1623_v6, %v1601_v57  ;;  %v2059_v20 = vld [vmem:[%s2356_s16] sm:$0xff] }
 0x599   : > { %v2044_v37 = vpop.eup %2043 }
 0x59a   : > { %v1644_v4 = vadd.f32 1.0, %v2044_v37  ;;  %v1933_v58 = vmul.f32 -1.442695, %v1629_v32  ;;  %v1934_v59 = vmul.f32 -1.442695, %v1630_v56  ;;  %v2060_v32 = vld [vmem:[%s2356_s16 + $0x40] sm:$0xff] }
 0x59b   : > { %v2046_v45 = vpop.eup %2045 }
 0x59c   : > { %v1647_v11 = vadd.f32 1.0, %v2046_v45  ;;  %2047 = vrcp.f32 %v1644_v4  ;;  %v1659_v17 = vand.u32 2147483648, %v1644_v4  ;;  %v1657_v26 = vand.u32 2147483647, %v1644_v4 }
 0x59d   : > { %2049 = vpow2.f32 %v1933_v58  ;;  %vm1653_vm13 = vweird.f32 %v1644_v4  ;;  %v1742_v57 = vpop.permute.xlu1 %1741 }
 0x59e   : > { %2051 = vrcp.f32 %v1647_v11  ;;  %v1704_v30 = vand.u32 2147483648, %v1647_v11  ;;  %v1702_v5 = vand.u32 2147483647, %v1647_v11  ;;  %v1660_v28 = vor.u32 1.1754944e-38, %v1659_v17  ;;  %v3238_v25 = vpop.permute.xlu0 %1731 }
 0x59f   : > { %2053 = vpow2.f32 %v1934_v59  ;;  %vm1698_vm1 = vweird.f32 %v1647_v11  ;;  %vm1658_vm12 = vcmp.eq.f32.partialorder %v1657_v26, 8.507059e+37  ;;  %v2061_v59 = vld [vmem:[%s2356_s16 + $0x18] sm:$0xff]  ;;  %v2065_v26 = vld [vmem:[%s2356_s16 + $0x60] sm:$0xff] }
 0x5a0   : > { %v1705_v8 = vor.u32 1.1754944e-38, %v1704_v30  ;;  %vm1703_vm3 = vcmp.eq.f32.partialorder %v1702_v5, 8.507059e+37  ;;  %v2066_v5 = vld [vmem:[%s2356_s16 + $0x78] sm:$0xff] }
 0x5a2   : > { %v2048_v27 = vpop.eup %2047 }
 0x5a3   : > { %v2050_v53 = vpop.eup %2049  ;;  %v1649_v40 = vmul.f32 %v2048_v27, %v1644_v4  ;;  %vm1654_vm11 = vweird.f32 %v2048_v27 }
 0x5a4   : > { %v2052_v60 = vpop.eup %2051  ;;  %v3214_v62 = vadd.f32 1.0, %v2050_v53  ;;  %vm1655_vm15 = vmor %vm1653_vm13, %vm1654_vm11  ;;  %vm3372_vm11 = vcmask 130048  }
 0x5a5   : > { %v2054_v21 = vpop.eup %2053  ;;  %v1694_v35 = vmul.f32 %v2052_v60, %v1647_v11  ;;  %v1650_v16 = vsub.f32 1.0, %v1649_v40  ;;  %vm1699_vm14 = vweird.f32 %v2052_v60  ;;  %vm3373_vm13 = vmmov %vm3372_vm11 }
 0x5a6   : > { %v3216_v63 = vadd.f32 1.0, %v2054_v21  ;;  %2055 = vrcp.f32 %v3214_v62  ;;  %v1674_v54 = vand.u32 2147483648, %v3214_v62  ;;  %v1672_v42 = vand.u32 2147483647, %v3214_v62  ;;  %vm1700_vm2 = vmor %vm1698_vm1, %vm1699_vm14 }
 0x5a7   : > { %v1695_v43 = vsub.f32 1.0, %v1694_v35  ;;  %v1651_v38 = vmul.f32 %v2048_v27, %v1650_v16  ;;  %vm1668_vm4 = vweird.f32 %v3214_v62  ;;  %vm3374_vm14 = vmmov %vm3372_vm11 }
 0x5a8   : > { %2057 = vrcp.f32 %v3216_v63  ;;  %v1675_v61 = vor.u32 1.1754944e-38, %v1674_v54  ;;  %vm1683_vm7 = vweird.f32 %v3216_v63  ;;  %v1689_v36 = vand.u32 2147483648, %v3216_v63 }
 0x5a9   : > { %v1696_v19 = vmul.f32 %v2052_v60, %v1695_v43  ;;  %v1652_v7 = vadd.f32 %v2048_v27, %v1651_v38  ;;  %vm3233_vm8 = vcmp.eq.f32.partialorder %v1672_v42, 8.507059e+37  ;;  %v1687_v18 = vand.u32 2147483647, %v3216_v63  ;;  %v2067_v42 = vld [vmem:[%s2356_s16 + $0x8] sm:$0xff] }
 0x5aa   : > { %v1690_v40 = vor.u32 1.1754944e-38, %v1689_v36 }
 0x5ab   : > { %v1656_v14 = vsel %vm1655_vm15, %v2048_v27, %v1652_v7  ;;  %v1697_v50 = vadd.f32 %v2052_v60, %v1696_v19  ;;  %v2062_v27 = vld [vmem:[%s2356_s16 + $0x58] sm:$0xff]  ;;  %vm1688_vm6 = vcmp.eq.f32.partialorder %v1687_v18, 8.507059e+37  ;;  %vm3375_vm15 = vmmov %vm3372_vm11 }
 0x5ac   : > { %v2056_v15 = vpop.eup %2055  ;;  %v1661_v39 = vsel %vm1658_vm12, %v1660_v28, %v1656_v14 }
 0x5ad   : > { %v1664_v52 = vmul.f32 %v2056_v15, %v3214_v62  ;;  %v1701_v34 = vsel %vm1700_vm2, %v2052_v60, %v1697_v50  ;;  %v1720_v29 = vmul.f32 %v3223_v31, %v1661_v39  ;;  %vm1669_vm10 = vweird.f32 %v2056_v15  ;;  %v2063_v62 = vld [vmem:[%s2356_s16 + $0x20] sm:$0xff] }
 0x5ae   : > { %v2058_v48 = vpop.eup %2057  ;;  %v1706_v23 = vsel %vm1703_vm3, %v1705_v8, %v1701_v34  ;;  %vm3245_vm9 = vmor %vm1668_vm4, %vm1669_vm10  ;;  %v2068_v34 = vld [vmem:[%s2356_s16 + $0x48] sm:$0xff] }
 0x5af   : > { %v1665_v12 = vsub.f32 1.0, %v1664_v52  ;;  %v1679_v49 = vmul.f32 %v2058_v48, %v3216_v63  ;;  %v1723_v9 = vmul.f32 %v3223_v31, %v1706_v23  ;;  %v1744_v46 = vperm.slane %v1720_v29, 0  ;;  %v2064_v63 = vld [vmem:[%s2356_s16 + $0x38] sm:$0xff] }
 0x5b0   : > { %vm1684_vm0 = vweird.f32 %v2058_v48 }
 0x5b1   : > { %v1666_v13 = vmul.f32 %v2056_v15, %v1665_v12  ;;  %v1680_v2 = vsub.f32 1.0, %v1679_v49  ;;  %v1747_v55 = vperm.slane %v1723_v9, 0  ;;  %v1748_v3 = vadd.f32 %v1744_v46, %v3220_v47  ;;  %vm1685_vm5 = vmor %vm1683_vm7, %vm1684_vm0  ;;  %v2070_v12 = vld [vmem:[%s2356_s16 + $0x50] sm:$0xff]  ;;  %v2071_v9 = vld [vmem:[%s2356_s16 + $0x28] sm:$0xff] }
 0x5b2   : > { %v1756_v0 = vadd.f32 %v1744_v46, %v1737_v24  ;;  %v1752_v41 = vadd.f32 %v1744_v46, %v3238_v25  ;;  %v1760_v4 = vadd.f32 %v1744_v46, %v1742_v57  ;;  %v2073_v46 = vld [vmem:[%s2356_s16 + $0x68] sm:$0xff] }
 0x5b3   : > { %v1681_v51 = vmul.f32 %v2058_v48, %v1680_v2  ;;  %v1667_v33 = vadd.f32 %v2056_v15, %v1666_v13  ;;  %v1751_v44 = vadd.f32 %v1747_v55, %v3220_v47  ;;  %v1759_v22 = vadd.f32 %v1747_v55, %v1737_v24  ;;  %v2074_v13 = vld [vmem:[%s2356_s16 + $0x70] sm:$0xff] }
 0x5b4   : > { %v1764_v6 = vmul.f32 %v2059_v20, %v1748_v3  ;;  %v1772_v56 = vmul.f32 %v2060_v32, %v1756_v0  ;;  %v1755_v37 = vadd.f32 %v1747_v55, %v3238_v25  ;;  %v1768_v21 = vmul.f32 %v2063_v62, %v1752_v41 }
 0x5b5   : > { %v1671_v58 = vsel %vm3245_vm9, %v2056_v15, %v1667_v33  ;;  %v1682_v45 = vadd.f32 %v2058_v48, %v1681_v51  ;;  %v1767_v11 = vmul.f32 %v2061_v59, %v1751_v44  ;;  %v1775_v53 = vmul.f32 %v2062_v27, %v1759_v22 }
 0x5b6   : > { %v1676_v60 = vsel %vm3233_vm8, %v1675_v61, %v1671_v58  ;;  %1780 = vst [vmem:[%s3263_s19] sm:$0xff] %v1764_v6  ;;  %v1763_v35 = vadd.f32 %v1747_v55, %v1742_v57  ;;  %v1771_v43 = vmul.f32 %v2064_v63, %v1755_v37  ;;  %v1776_v30 = vmul.f32 %v2065_v26, %v1760_v4 }
 0x5b7   : > { %v1686_v16 = vsel %vm1685_vm5, %v2058_v48, %v1682_v45  ;;  %v1721_v17 = vmul.f32 %v3223_v31, %v1676_v60  ;;  %1783 = vst.msk [vmem:[%s3263_s19 + $0x18] sm:$0xff] %vm3372_vm11, %v1767_v11 }
 0x5b8   : > { %v1691_v38 = vsel %vm1688_vm6, %v1690_v40, %v1686_v16  ;;  %1788 = vst [vmem:[%s3263_s19 + $0x40] sm:$0xff] %v1772_v56  ;;  %v1779_v28 = vmul.f32 %v2066_v5, %v1763_v35 }
 0x5b9   : > { %v1722_v19 = vmul.f32 %v3223_v31, %v1691_v38  ;;  %v1745_v7 = vperm.slane %v1721_v17, 0  ;;  %1791 = vst.msk [vmem:[%s3263_s19 + $0x58] sm:$0xff] %vm3373_vm13, %v1775_v53 }
 0x5ba   : > { %1784 = vst [vmem:[%s3263_s19 + $0x20] sm:$0xff] %v1768_v21 }
 0x5bb   : > { %v1746_v54 = vperm.slane %v1722_v19, 0  ;;  %v1749_v14 = vadd.f32 %v1745_v7, %v3220_v47  ;;  %v1757_v50 = vadd.f32 %v1745_v7, %v1737_v24  ;;  %v1753_v15 = vadd.f32 %v1745_v7, %v3238_v25  ;;  %1787 = vst.msk [vmem:[%s3263_s19 + $0x38] sm:$0xff] %vm3374_vm14, %v1771_v43 }
 0x5bc   : > { %v1761_v31 = vadd.f32 %v1745_v7, %v1742_v57  ;;  %1792 = vst [vmem:[%s3263_s19 + $0x60] sm:$0xff] %v1776_v30 }
 0x5bd   : > { %v1750_v8 = vadd.f32 %v1746_v54, %v3220_v47  ;;  %v1758_v39 = vadd.f32 %v1746_v54, %v1737_v24  ;;  %v1765_v52 = vmul.f32 %v2067_v42, %v1749_v14  ;;  %v1773_v29 = vmul.f32 %v2068_v34, %v1757_v50  ;;  %1795 = vst.msk [vmem:[%s3263_s19 + $0x78] sm:$0xff] %vm3375_vm15, %v1779_v28  ;;  %v2069_v47 = vld [vmem:[%s2356_s16 + $0x10] sm:$0xff] }
 0x5be   : > { %v1754_v48 = vadd.f32 %v1746_v54, %v3238_v25  ;;  %v1762_v61 = vadd.f32 %v1746_v54, %v1742_v57  ;;  %v1769_v36 = vmul.f32 %v2071_v9, %v1753_v15  ;;  %v1777_v24 = vmul.f32 %v2073_v46, %v1761_v31 }
 0x5bf   : > { %v1766_v23 = vmul.f32 %v2069_v47, %v1750_v8  ;;  %v1774_v49 = vmul.f32 %v2070_v12, %v1758_v39  ;;  %1781 = vst [vmem:[%s3263_s19 + $0x8] sm:$0xff] %v1765_v52 }
 0x5c0   : > { %1789 = vst [vmem:[%s3263_s19 + $0x48] sm:$0xff] %v1773_v29  ;;  %v1770_v18 = vmul.f32 %v2072_v10, %v1754_v48  ;;  %v1778_v2 = vmul.f32 %v2074_v13, %v1762_v61 }
 0x5c1   : > { %1782 = vst [vmem:[%s3263_s19 + $0x10] sm:$0xff] %v1766_v23 }
 0x5c2   : > { %1790 = vst [vmem:[%s3263_s19 + $0x50] sm:$0xff] %v1774_v49 }
 0x5c3   : > { %1785 = vst [vmem:[%s3263_s19 + $0x28] sm:$0xff] %v1769_v36 }
 0x5c4   : > { %1786 = vst [vmem:[%s3263_s19 + $0x30] sm:$0xff] %v1770_v18 }
 0x5c5   : > { %1793 = vst [vmem:[%s3263_s19 + $0x68] sm:$0xff] %v1777_v24 }
 0x5c6   : > { %1794 = vst [vmem:[%s3263_s19 + $0x70] sm:$0xff] %v1778_v2 }
 0x5c7   : > { %2147 = shalt.err (!%p2144_p8)
}
 0x5c8   : > { %s2211_s9 = smov 512   ;;  %s2212_s26 = smov 32  }
 0x5c9   : > { %1950 = dma.vmem_to_hbm [thread:$0]  (%p2305_p11), %s1810_s12, 2048, %s1812_s20, %s1797_s21, %s2211_s9, %s2211_s9, %s2212_s26  }
 0x5ca PF: > { %s1826_s18 = sand.u32 1, %s2178_s24   ;;  %p3376_p9 = scmp.ge.s32.totalorder %s2190_s27, 2 }
 0x5cb   : > { %s1827_s22 = scalar_lea.sflag [#allocation4], %s1826_s18 }
 0x5cc   : > { %p1961_p10 = pnand %p3376_p9, %p2309_p12 }
 0x5ce   : > { %p1962_p1 = pneg %p1961_p10 }
 0x5d0   : > { %2173 = dma.done.wait (%p1962_p1), %s1827_s22, 2048  }
 0x5d1   : > { %2175 = vsyncadd (%p1962_p1), %s1827_s22, 4294965248  ;;  %s3377_s27 = sld [smem:[#allocation12_spill]]  ;;  %s3380_s24 = smov %s2182_s25 }
 0x5d2   : > { %s3378_s19 = sld [smem:[#allocation11_spill]] }
 0x5d3   : > { %s3379_s26 = sld [smem:[#allocation13_spill]] }
 0x5d7   : > { %p21_p2 = scmp.ge.s32.totalorder %s3377_s27, 4  }
 0x5d8   : > { %s3381_s25 = smov %s3378_s19 }
 0x5d9   :  { %23 = sbr.rel (!%p21_p2) target bundleno = 8 (0x8), region = 100 }
 0x5de   :  { %1833 = vsyncpa [#allocation3], 1 }
 0x5df   :  { %1835 = vsyncpa [#allocation3 + $0x1], 1 }
 0x5e0   :  { %1836 = vsyncpa [#allocation4], 1 }
 0x5e1   :  { %1838 = vsyncpa [#allocation4 + $0x1], 1 }
 0x5e2   :  { %1839 = vsyncpa [#allocation5], 1 }
 0x5e3   :  { %1841 = vsyncpa [#allocation5 + $0x1], 1 }

</bundles_post_ra>
